<compile_context>
chip_gen: v5e
topology: v5e:2x2
jax: 0.10.0
libtpu: 0.0.40
codegen_flags: <defaults>
</compile_context>

<pallas_src>
import jax
import jax.numpy as jnp
from jax.experimental import pallas as pl
from jax.experimental.pallas import tpu as pltpu

_LANE_WIDTH = 512            # lane-dense last dim: multiple of 128
_PALLAS_MIN_ELEMS = 64 * 1024


def _sigmoid_kernel(x_ref, o_ref):
    # Logistic lowers onto the EUP (exp + reciprocal); VALU slot stays free.
    o_ref[...] = jax.nn.sigmoid(x_ref[...]).astype(o_ref.dtype)


def _round_up(n: int, m: int) -> int:
    return ((n + m - 1) // m) * m


def _sublane_pack(dtype) -> int:
    # Sub-32-bit dtypes pack along sublanes: 8 for f32, 16 for bf16, 32 for int8/fp8.
    return max(8, 32 // jnp.dtype(dtype).itemsize)


def _tile_config():
    """Per-generation (max_tile_rows, vmem_limit_bytes) for the streaming tiles."""
    kind = ""
    try:
        kind = jax.devices()[0].device_kind.lower()
    except Exception:
        pass
    if "v5" in kind:
        # 2 MiB f32 blocks: 4 buffers x 2 MiB = 8 MiB, under v5e's 16 MiB scoped default.
        return 1024, None
    if "v6" in kind:
        # 4 MiB blocks: 16 MiB double-buffered working set, under v6e's 32 MiB default.
        return 2048, None
    if "v7" in kind or "7x" in kind:
        # 8 MiB blocks: 32 MiB working set hits v7x's 32 MiB scoped default -> raise it
        # (physical VMEM per TC is 64 MiB; stay well under).
        return 4096, 48 << 20
    # Unknown chip: conservative (fits every generation's default scoped VMEM).
    return 1024, None


def _sigmoid_pallas_2d(x2d: jax.Array) -> jax.Array:
    rows, lane = x2d.shape
    dtype = x2d.dtype
    sub = _sublane_pack(dtype)
    max_tile_rows, vmem_limit = _tile_config()

    # >= 2 roughly balanced grid steps so v7x's two TensorCores both stream HBM;
    # tile height a multiple of the dtype's sublane packing.  Last block may
    # overhang `rows` (Pallas masks it) - no padding of the array itself.
    tile_rows = max(sub, min(max_tile_rows, _round_up(pl.cdiv(rows, 2), sub)))
    grid = (pl.cdiv(rows, tile_rows),)

    n = rows * lane
    itemsize = jnp.dtype(dtype).itemsize
    cost = pl.CostEstimate(
        flops=n, transcendentals=n, bytes_accessed=2 * n * itemsize)

    params = dict(dimension_semantics=("parallel",))
    if vmem_limit is not None:
        params["vmem_limit_bytes"] = vmem_limit

    return pl.pallas_call(
        _sigmoid_kernel,
        out_shape=jax.ShapeDtypeStruct((rows, lane), dtype),
        grid_spec=pltpu.PrefetchScalarGridSpec(
            num_scalar_prefetch=0,
            grid=grid,
            in_specs=[pl.BlockSpec((tile_rows, lane), lambda i: (i, 0))],
            out_specs=pl.BlockSpec((tile_rows, lane), lambda i: (i, 0)),
        ),
        compiler_params=pltpu.CompilerParams(**params),
        cost_estimate=cost,
    )(x2d)


def chen_forward(x: jax.Array) -> jax.Array:
    """Pallas equivalent of Chen.forward (torch.nn.Sigmoid)."""
    if x.size < _PALLAS_MIN_ELEMS:
        # Tiny inputs: launch + per-step overhead dominates; fused XLA op wins.
        return jax.nn.sigmoid(x)

    orig_shape = x.shape
    n = x.size
    n_main = (n // _LANE_WIDTH) * _LANE_WIDTH
    tail = n - n_main

    flat = jnp.reshape(x, (-1,))  # contiguous reshape: free

    if tail == 0:
        # Zero-copy path: reshape -> Pallas -> reshape.  No pad, no slice.
        out2d = _sigmoid_pallas_2d(jnp.reshape(flat, (-1, _LANE_WIDTH)))
        return jnp.reshape(out2d, orig_shape)

    # Ragged tail (< _LANE_WIDTH elems): Pallas on the aligned prefix, plain
    # sigmoid on the tiny remainder, stitched with a single concatenate.
    main = jax.lax.slice(flat, (0,), (n_main,))
    out_main = jnp.reshape(
        _sigmoid_pallas_2d(jnp.reshape(main, (-1, _LANE_WIDTH))), (-1,))
    out_tail = jax.nn.sigmoid(jax.lax.slice(flat, (n_main,), (n,)))
    return jnp.reshape(jnp.concatenate([out_main, out_tail]), orig_shape)


class Chen:
    """Mirror of the PyTorch module: forward(input) = sigmoid(input)."""

    def __call__(self, x: jax.Array) -> jax.Array:
        return chen_forward(x)


if __name__ == "__main__":
    key = jax.random.PRNGKey(0)
    k_small, k_aligned, k_odd, k_ragged = jax.random.split(key, 4)
    chen = Chen()

    def _check(x):
        out = jax.block_until_ready(chen(x))
        assert out.shape == x.shape and out.dtype == x.dtype
        assert jnp.allclose(out, jax.nn.sigmoid(x), atol=1e-5)

    # 1) Tiny input, mirrors torch.reshape(input, (-1, 1, 2, 2)) -> bypass path.
    small = jnp.reshape(
        jax.random.normal(k_small, (8,), dtype=jnp.float32), (-1, 1, 2, 2))
    _check(small)

    # 2) Aligned Pallas path (n % 512 == 0, rows multiple of 8): zero-copy.
    aligned = jnp.reshape(
        jax.random.normal(k_aligned, (131072,), dtype=jnp.float32), (-1, 1, 2, 2))
    _check(aligned)

    # 3) Aligned but rows NOT a multiple of 8 (512*131 elems): overhanging
    #    last block exercises Pallas masking, still zero-copy.
    odd_rows = jnp.reshape(
        jax.random.normal(k_odd, (512 * 131,), dtype=jnp.float32), (-1, 1, 2, 2))
    _check(odd_rows)

    # 4) Ragged tail (n % 512 == 4): Pallas prefix + tiny plain-sigmoid tail.
    ragged = jnp.reshape(
        jax.random.normal(k_ragged, (131076,), dtype=jnp.float32), (-1, 1, 2, 2))
    _check(ragged)

    print("KERNEL_OK")
</pallas_src>

<mosaic_0001>
module attributes {stable_mosaic.version = 11 : i64} {
  func.func @_sigmoid_kernel(%arg0: i32, %arg1: memref<128x512xf32, #tpu.memory_space<vmem>>, %arg2: memref<128x512xf32, #tpu.memory_space<vmem>>) attributes {dimension_semantics = [#tpu.dimension_semantics<parallel>], iteration_bounds = array<i64: 2>, scalar_prefetch = 0 : i64, scratch_operands = 0 : i64, tpu.core_type = #tpu.core_type<tc>, window_params = [{transform_indices = @transform_0, window_bounds = array<i64: 128, 512>}, {transform_indices = @transform_1, window_bounds = array<i64: 128, 512>}]} {
    %c0 = arith.constant 0 : index
    %c0_0 = arith.constant 0 : index
    %0 = vector.load %arg1[%c0, %c0_0] : memref<128x512xf32, #tpu.memory_space<vmem>>, vector<128x512xf32>
    %1 = arith.negf %0 : vector<128x512xf32>
    %2 = math.exp %1 : vector<128x512xf32>
    %cst = arith.constant 1.000000e+00 : f32
    %3 = vector.broadcast %cst : f32 to vector<128x512xf32>
    %4 = arith.addf %3, %2 : vector<128x512xf32>
    %5 = arith.divf %3, %4 : vector<128x512xf32>
    %c0_1 = arith.constant 0 : index
    %c0_2 = arith.constant 0 : index
    %6 = vector.load %arg2[%c0_1, %c0_2] : memref<128x512xf32, #tpu.memory_space<vmem>>, vector<128x512xf32>
    tpu.vector_store %arg2[%c0_1, %c0_2], %5 {strides = array<i32>} : memref<128x512xf32, #tpu.memory_space<vmem>>, vector<128x512xf32>,
    return
  }
  func.func @transform_0(%arg0: i32) -> (i32, i32) {
    %c0_i32 = arith.constant 0 : i32
    %c0_i32_0 = arith.constant 0 : i32
    return %arg0, %c0_i32 : i32, i32
  }
  func.func @transform_1(%arg0: i32) -> (i32, i32) {
    %c0_i32 = arith.constant 0 : i32
    %c0_i32_0 = arith.constant 0 : i32
    return %arg0, %c0_i32 : i32, i32
  }
}

</mosaic_0001>

<bundles_post_ra>
// kernel: tpu_custom_call.1
= control target key start
LH: loop header
LB: loop body
LE: loop exit
PB: predicated region body
PF: predicated region fallthrough
CT: control target
= control target key end

     0   :  { %6 = vsyncpa [#allocation3], 0  ;;  %s3680_s0 = inlined_call_operand.hbm [shape: f32[256,512], index: 0, kind: input, shape index: {}]   ;;  %s3681_s1 = inlined_call_operand.hbm [shape: f32[256,512], index: 1, kind: output, shape index: {}]  }
   0x1   :  { %8 = vsyncpa [#allocation3 + $0x1], 0 }
   0x2   :  { %9 = vsyncpa [#allocation4], 0 }
   0x3   :  { %11 = vsyncpa [#allocation4 + $0x1], 0  ;;  %s2076_s6 = smov 0   ;;  %s2078_s7 = smov 0  }
   0x4   :  { %s2080_s8 = smov 0   ;;  %s2082_s9 = smov 0  }
   0x5 LB: > { %s2097_s10 = sadd.s32 4294967295, %s2060_s9   ;;  %s1574_s11 = sadd.s32 4294967294, %s2060_s9   ;;  %s2060_s9 = sphi %s2082_s9, %s3918_s9   ;;  %s2056_s8 = sphi %s2080_s8, %s3917_s8   ;;  %s2052_s7 = sphi %s2078_s7, %s3916_s7   ;;  %s2048_s6 = sphi %s2076_s6, %s3915_s6  }
   0x6   : > { %s2101_s12 = sadd.s32 1, %s2060_s9   ;;  %s24_s13 = sadd.s32 1, %s2056_s8 }
   0x7   : > { %s21_s14 = ssub.s32 %s2060_s9, %s2101_s12  ;;  %p31_p0 = scmp.ne.s32.totalorder %s2056_s8, %s2052_s7 }
   0x8   : > { %p22_p1 = scmp.eq.s32.totalorder %s21_s14, 0  ;;  %p32_p2 = scmp.eq.s32.totalorder %s2060_s9, 0 }
   0x9   : > { %p37_p3 = scmp.ne.s32.totalorder %s2052_s7, %s2048_s6  ;;  %p38_p4 = scmp.eq.s32.totalorder %s2097_s10, 0 }
   0xa   : > { %s2113_s15 = scalar_select %p22_p1, %s2056_s8, %s24_s13  }
   0xb   : > { %p2115_p5 = por %p32_p2, %p31_p0  ;;  %p2119_p6 = por %p38_p4, %p37_p3 }
   0xc   : > { %p61_p7 = scmp.eq.s32.totalorder %s2097_s10, 1  ;;  %p67_p8 = scmp.eq.s32.totalorder %s1574_s11, 1 }
   0xd   : > { %p1670_p10 = scmp.lt.s32.totalorder %s2060_s9, 2  ;;  %s87_s20 = sand.u32 1, %s2056_s8  }
   0xe   : > { %p2126_p11 = por %p61_p7, %p31_p0  ;;  %p2130_p12 = por %p67_p8, %p37_p3 }
   0xf   : > { %s1655_s21 = sshll.u32 %s2060_s9, 9  ;;  %s1577_s22 = sshll.u32 %s87_s20, 9 }
  0x10   : > { %s97_s25 = scalar_lea.hbm %s3680_s0, %s1655_s21  ;;  %s91_s27 = scalar_lea.vmem [#allocation2], %s1577_s22 }
  0x11   : > { %s98_s26 = sshll.u32 %s97_s25, 4  ;;  %s100_s28 = sshll.u32 %s91_s27, 4  ;;  %s99_s26 = int_to_ptr.hbm [resolvable:$true] %s98_s26  ;;  %s101_s28 = int_to_ptr.vmem [resolvable:$true] %s100_s28 }
  0x12   : > { %p2141_p13 = pnand %p1670_p10, %p2115_p5  ;;  %p1581_p0 = scmp.ge.s32.totalorder %s2060_s9, 1 }
  0x13   : > { %p108_p1 = scmp.lt.s32.totalorder %s2060_s9, 3  ;;  %s88_s30 = scalar_lea.sflag [#allocation3], %s87_s20 }
  0x14   : > { %s1964_s2 = sshra.s32 %s99_s26, 4  ;;  %p1968_p3 = pneg %p2141_p13  ;;  %s1965_s2 = int_to_ptr.hbm [resolvable:$true] %s1964_s2 }
  0x15   : > { %s1966_s3 = scalar_lea.hbm %s1965_s2, 512  ;;  %s1971_s11 = scalar_lea.hbm %s3680_s0, 1024 }
  0x16   : > { %p1967_p2 = scmp.ne.s32.totalorder %s1965_s2, %s1966_s3  ;;  %p1972_p5 = scmp.lt.s32.totalorder %s1965_s2, %s3680_s0 }
  0x17   : > { %p1973_p8 = scmp.lt.s32.totalorder %s1971_s11, %s1966_s3 }
  0x18   : > { %p1969_p4 = pnand %p1968_p3, %p1967_p2 }
  0x19   : > { %p1974_p10 = por %p1973_p8, %p1972_p5 }
  0x1a   : > { %p1970_p7 = pneg %p1969_p4 }
  0x1c   : > { %p1975_p9 = pnand %p1974_p10, %p1970_p7 }
  0x1e   : > { %1978 = shalt.err (!%p1975_p9)
}
  0x1f   : > { %s2062_s16 = smov 512   ;;  %s2063_s20 = smov 32  }
  0x20   : > { %1665 = dma.hbm_to_vmem [thread:$0]  (!%p2141_p13), %s99_s26, 8192, %s101_s28, %s88_s30, %s2062_s16, %s2062_s16, %s2063_s20  }
  0x21   : > { %p109_p2 = pnand %p1581_p0, %p108_p1 }
  0x22   : > { %s2162_s21 = sand.u32 (!%p109_p2), 1, %s2052_s7  }
  0x23   : > { %112 = sbr.rel (%p109_p2) target bundleno = 312 (0x138), region = 24  ;;  %s1582_s22 = sshll.u32 (!%p109_p2), %s2162_s21, 9 }
  0x24   : > { %s115_s23 = scalar_lea.sflag (!%p109_p2), [#allocation3], %s2162_s21  ;;  %s2168_s24 = scalar_lea.vmem (!%p109_p2), [#allocation2], %s1582_s22 }
  0x28   : > { %2039 = dma.done.wait (%p2119_p6), %s115_s23, 8192  }
  0x29   : > { %2041 = vsyncadd (%p2119_p6), %s115_s23, 4294959104  ;;  %v140_v0 = vld [vmem:[%s2168_s24] sm:$0xff]  ;;  %v141_v1 = vld [vmem:[%s2168_s24 + $0x8] sm:$0xff]  ;;  %s2291_s17 = scalar_lea.vmem [#allocation5], %s1582_s22  ;;  %s1657_s25 = sshll.u32 %s2097_s10, 9 }
  0x2a   : > { %v142_v2 = vld [vmem:[%s2168_s24 + $0x10] sm:$0xff]  ;;  %v1584_v3 = vmul.f32 -1.442695, %v140_v0  ;;  %v1585_v4 = vmul.f32 -1.442695, %v141_v1  ;;  %v143_v6 = vld [vmem:[%s2168_s24 + $0x18] sm:$0xff]  ;;  %s1497_s27 = scalar_lea.hbm %s3681_s1, %s1657_s25 }
  0x2b   : > { %v1586_v5 = vmul.f32 -1.442695, %v142_v2  ;;  %v144_v7 = vld [vmem:[%s2168_s24 + $0x20] sm:$0xff]  ;;  %v145_v8 = vld [vmem:[%s2168_s24 + $0x28] sm:$0xff]  ;;  %v1587_v9 = vmul.f32 -1.442695, %v143_v6 }
  0x2c   : > { %1708 = vpow2.f32 %v1584_v3  ;;  %v1588_v10 = vmul.f32 -1.442695, %v144_v7  ;;  %v1589_v11 = vmul.f32 -1.442695, %v145_v8  ;;  %v146_v12 = vld [vmem:[%s2168_s24 + $0x30] sm:$0xff]  ;;  %v147_v13 = vld [vmem:[%s2168_s24 + $0x38] sm:$0xff] }
  0x2d   : > { %1710 = vpow2.f32 %v1585_v4  ;;  %v1590_v14 = vmul.f32 -1.442695, %v146_v12  ;;  %v1591_v15 = vmul.f32 -1.442695, %v147_v13  ;;  %v148_v16 = vld [vmem:[%s2168_s24 + $0x40] sm:$0xff]  ;;  %v149_v20 = vld [vmem:[%s2168_s24 + $0x48] sm:$0xff] }
  0x2e   : > { %1712 = vpow2.f32 %v1586_v5  ;;  %v150_v21 = vld [vmem:[%s2168_s24 + $0x50] sm:$0xff]  ;;  %v1592_v24 = vmul.f32 -1.442695, %v148_v16  ;;  %v151_v27 = vld [vmem:[%s2168_s24 + $0x58] sm:$0xff]  ;;  %v2194_v30 = vmul.f32 -1.442695, %v149_v20 }
  0x2f   : > { %1714 = vpow2.f32 %v1587_v9  ;;  %v2196_v31 = vmul.f32 -1.442695, %v150_v21  ;;  %v2207_v38 = vmul.f32 -1.442695, %v151_v27  ;;  %v156_v7 = vld [vmem:[%s2168_s24 + $0x80] sm:$0xff]  ;;  %s1498_s28 = sshll.u32 %s2291_s17, 4  ;;  %s1499_s28 = int_to_ptr.vmem [resolvable:$true] %s1498_s28 }
  0x30   : > { %1716 = vpow2.f32 %v1588_v10  ;;  %s1500_s29 = sshll.u32 %s1497_s27, 4  ;;  %s1485_s30 = scalar_lea.sflag [#allocation4], %s2162_s21  ;;  %s1501_s29 = int_to_ptr.hbm [resolvable:$true] %s1500_s29 }
  0x31   : > { %1718 = vpow2.f32 %v1589_v11  ;;  %s2008_s2 = sshra.s32 %s1501_s29, 4  ;;  %s2014_s11 = scalar_lea.hbm %s3681_s1, 1024  ;;  %s2009_s2 = int_to_ptr.hbm [resolvable:$true] %s2008_s2 }
  0x32   : > { %v1709_v17 = vpop.eup %1708  ;;  %1720 = vpow2.f32 %v1590_v14  ;;  %s2010_s3 = scalar_lea.hbm %s2009_s2, 512  ;;  %p2015_p0 = scmp.lt.s32.totalorder %s2009_s2, %s3681_s1 }
  0x33   : > { %v1711_v18 = vpop.eup %1710  ;;  %v2183_v19 = vadd.f32 1.0, %v1709_v17  ;;  %1722 = vpow2.f32 %v1591_v15  ;;  %p2011_p6 = scmp.ne.s32.totalorder %s2009_s2, %s2010_s3  ;;  %p2016_p1 = scmp.lt.s32.totalorder %s2014_s11, %s2010_s3 }
  0x34   : > { %v1713_v22 = vpop.eup %1712  ;;  %v2187_v23 = vadd.f32 1.0, %v1711_v18 }
  0x35   : > { %v1715_v25 = vpop.eup %1714  ;;  %1724 = vrcp.f32 %v2183_v19  ;;  %v471_v26 = vand.u32 2147483648, %v2183_v19  ;;  %v469_v29 = vand.u32 2147483647, %v2183_v19  ;;  %v2200_v35 = vadd.f32 1.0, %v1713_v22  ;;  %p2012_p9 = pnand %p2011_p6, %p2126_p11  ;;  %p2017_p3 = por %p2016_p1, %p2015_p0 }
  0x36   : > { %v1717_v28 = vpop.eup %1716  ;;  %1726 = vrcp.f32 %v2187_v23  ;;  %v484_v33 = vand.u32 2147483647, %v2187_v23  ;;  %v486_v34 = vand.u32 2147483648, %v2187_v23  ;;  %v2202_v36 = vadd.f32 1.0, %v1715_v25  ;;  %v159_v25 = vld [vmem:[%s2168_s24 + $0x98] sm:$0xff] }
  0x37   : > { %v1719_v32 = vpop.eup %1718  ;;  %vm465_vm0 = vweird.f32 %v2183_v19  ;;  %v2205_v37 = vadd.f32 1.0, %v1717_v28  ;;  %1728 = vpow2.f32 %v1592_v24  ;;  %v472_v40 = vor.u32 1.1754944e-38, %v471_v26  ;;  %p2013_p13 = pneg %p2012_p9 }
  0x38   : > { %v1721_v39 = vpop.eup %1720  ;;  %vm480_vm1 = vweird.f32 %v2187_v23  ;;  %1730 = vrcp.f32 %v2200_v35  ;;  %v501_v41 = vand.u32 2147483648, %v2200_v35  ;;  %vm2212_vm2 = vcmp.eq.f32.partialorder %v469_v29, 8.507059e+37 }
  0x39   : > { %v1723_v42 = vpop.eup %1722  ;;  %v499_v44 = vand.u32 2147483647, %v2200_v35  ;;  %1732 = vrcp.f32 %v2202_v36  ;;  %v516_v45 = vand.u32 2147483648, %v2202_v36  ;;  %v2219_v46 = vadd.f32 1.0, %v1719_v32  ;;  %p2018_p4 = pnand %p2017_p3, %p2013_p13 }
  0x3a   : > { %vm2221_vm3 = vcmp.eq.f32.partialorder %v484_v33, 8.507059e+37  ;;  %v487_v49 = vor.u32 1.1754944e-38, %v486_v34  ;;  %v514_v50 = vand.u32 2147483647, %v2202_v36  ;;  %1734 = vrcp.f32 %v2205_v37 }
  0x3b   : > { %v1725_v47 = vpop.eup %1724  ;;  %vm495_vm4 = vweird.f32 %v2200_v35  ;;  %v2229_v53 = vor.u32 1.1754944e-38, %v501_v41  ;;  %vm510_vm5 = vweird.f32 %v2202_v36  ;;  %vm525_vm6 = vweird.f32 %v2205_v37 }
  0x3c   : > { %v1727_v51 = vpop.eup %1726  ;;  %v461_v52 = vmul.f32 %v1725_v47, %v2183_v19  ;;  %v529_v55 = vand.u32 2147483647, %v2205_v37  ;;  %v531_v56 = vand.u32 2147483648, %v2205_v37  ;;  %vm466_vm7 = vweird.f32 %v1725_v47 }
  0x3d   : > { %v476_v54 = vmul.f32 %v1727_v51, %v2187_v23  ;;  %v1729_v57 = vpop.eup %1728  ;;  %vm2236_vm8 = vcmp.eq.f32.partialorder %v499_v44, 8.507059e+37  ;;  %v2240_v60 = vor.u32 1.1754944e-38, %v516_v45  ;;  %1736 = vrcp.f32 %v2219_v46  ;;  %vm2257_vm13 = vmor %vm465_vm0, %vm466_vm7  ;;  %v153_v45 = vld [vmem:[%s2168_s24 + $0x68] sm:$0xff] }
  0x3e   : > { %v462_v58 = vsub.f32 1.0, %v461_v52  ;;  %v1731_v61 = vpop.eup %1730  ;;  %vm481_vm9 = vweird.f32 %v1727_v51  ;;  %vm2243_vm10 = vcmp.eq.f32.partialorder %v514_v50, 8.507059e+37  ;;  %v544_v0 = vand.u32 2147483647, %v2219_v46 }
  0x3f   : > { %v477_v62 = vsub.f32 1.0, %v476_v54  ;;  %v1733_v1 = vpop.eup %1732  ;;  %v491_v3 = vmul.f32 %v1731_v61, %v2200_v35  ;;  %vm2250_vm12 = vcmp.eq.f32.partialorder %v529_v55, 8.507059e+37  ;;  %v532_v5 = vor.u32 1.1754944e-38, %v531_v56  ;;  %vm2266_vm15 = vmor %vm480_vm1, %vm481_vm9 }
  0x40   : > { %v463_v2 = vmul.f32 %v1725_v47, %v462_v58  ;;  %v1735_v6 = vpop.eup %1734  ;;  %vm496_vm14 = vweird.f32 %v1731_v61  ;;  %v506_v9 = vmul.f32 %v1733_v1, %v2202_v36  ;;  %v546_v10 = vand.u32 2147483648, %v2219_v46  ;;  %v152_v36 = vld [vmem:[%s2168_s24 + $0x60] sm:$0xff] }
  0x41   : > { %v478_v8 = vmul.f32 %v1727_v51, %v477_v62  ;;  %v492_v13 = vsub.f32 1.0, %v491_v3  ;;  %vm511_vm11 = vweird.f32 %v1733_v1  ;;  %v521_v14 = vmul.f32 %v1735_v6, %v2205_v37  ;;  %vm2284_vm1 = vmor %vm495_vm4, %vm496_vm14  ;;  %v154_v62 = vld [vmem:[%s2168_s24 + $0x70] sm:$0xff] }
  0x42   : > { %v464_v11 = vadd.f32 %v1725_v47, %v463_v2  ;;  %v507_v16 = vsub.f32 1.0, %v506_v9  ;;  %vm526_vm0 = vweird.f32 %v1735_v6  ;;  %v2271_v17 = vadd.f32 1.0, %v1721_v39  ;;  %v155_v2 = vld [vmem:[%s2168_s24 + $0x78] sm:$0xff] }
  0x43   : > { %v479_v15 = vadd.f32 %v1727_v51, %v478_v8  ;;  %v1737_v18 = vpop.eup %1736  ;;  %v493_v20 = vmul.f32 %v1731_v61, %v492_v13  ;;  %v522_v21 = vsub.f32 1.0, %v521_v14  ;;  %v2275_v22 = vadd.f32 1.0, %v1723_v42  ;;  %vm2309_vm4 = vmor %vm525_vm6, %vm526_vm0 }
  0x44   : > { %v468_v19 = vsel %vm2257_vm13, %v1725_v47, %v464_v11  ;;  %v508_v26 = vmul.f32 %v1733_v1, %v507_v16  ;;  %v536_v27 = vmul.f32 %v1737_v18, %v2219_v46  ;;  %v2303_v34 = vadd.f32 1.0, %v1729_v57 }
  0x45   : > { %v473_v23 = vsel %vm2212_vm2, %v472_v40, %v468_v19  ;;  %v483_v24 = vsel %vm2266_vm15, %v1727_v51, %v479_v15  ;;  %v494_v29 = vadd.f32 %v1731_v61, %v493_v20  ;;  %vm2299_vm2 = vmor %vm510_vm5, %vm511_vm11  ;;  %v523_v33 = vmul.f32 %v1735_v6, %v522_v21  ;;  %v158_v20 = vld [vmem:[%s2168_s24 + $0x90] sm:$0xff] }
  0x46   : > { %1420 = vst [vmem:[%s2291_s17] sm:$0xff] %v473_v23  ;;  %v488_v28 = vsel %vm2221_vm3, %v487_v49, %v483_v24  ;;  %v509_v35 = vadd.f32 %v1733_v1, %v508_v26  ;;  %v537_v40 = vsub.f32 1.0, %v536_v27  ;;  %vm541_vm3 = vweird.f32 %v1737_v18 }
  0x47   : > { %1421 = vst [vmem:[%s2291_s17 + $0x8] sm:$0xff] %v488_v28  ;;  %1738 = vrcp.f32 %v2271_v17  ;;  %v498_v41 = vsel %vm2284_vm1, %v1731_v61, %v494_v29  ;;  %v524_v42 = vadd.f32 %v1735_v6, %v523_v33  ;;  %v559_v43 = vand.u32 2147483647, %v2271_v17 }
  0x48   : > { %v561_v44 = vand.u32 2147483648, %v2271_v17  ;;  %v503_v37 = vsel %vm2236_vm8, %v2229_v53, %v498_v41  ;;  %v513_v47 = vsel %vm2299_vm2, %v1733_v1, %v509_v35  ;;  %v538_v48 = vmul.f32 %v1737_v18, %v537_v40  ;;  %v160_v41 = vld [vmem:[%s2168_s24 + $0xa0] sm:$0xff] }
  0x49   : > { %1740 = vrcp.f32 %v2275_v22  ;;  %1422 = vst [vmem:[%s2291_s17 + $0x10] sm:$0xff] %v503_v37  ;;  %v518_v49 = vsel %vm2243_vm10, %v2240_v60, %v513_v47  ;;  %v528_v50 = vsel %vm2309_vm4, %v1735_v6, %v524_v42  ;;  %vm3707_vm5 = vweird.f32 %v2219_v46  ;;  %v161_v42 = vld [vmem:[%s2168_s24 + $0xa8] sm:$0xff] }
  0x4a   : > { %vm2335_vm6 = vmor %vm3707_vm5, %vm541_vm3  ;;  %v547_v52 = vor.u32 1.1754944e-38, %v546_v10  ;;  %v1596_v53 = vmul.f32 -1.442695, %v152_v36  ;;  %1423 = vst [vmem:[%s2291_s17 + $0x18] sm:$0xff] %v518_v49  ;;  %v533_v54 = vsel %vm2250_vm12, %v532_v5, %v528_v50  ;;  %v539_v55 = vadd.f32 %v1737_v18, %v538_v48 }
  0x4b   : > { %vm545_vm7 = vcmp.eq.f32.partialorder %v544_v0, 8.507059e+37  ;;  %v1597_v56 = vmul.f32 -1.442695, %v153_v45  ;;  %1424 = vst [vmem:[%s2291_s17 + $0x20] sm:$0xff] %v533_v54  ;;  %vm555_vm8 = vweird.f32 %v2271_v17  ;;  %vm2346_vm9 = vcmp.eq.f32.partialorder %v559_v43, 8.507059e+37 }
  0x4c   : > { %v562_v58 = vor.u32 1.1754944e-38, %v561_v44  ;;  %1742 = vrcp.f32 %v2303_v34  ;;  %v543_v60 = vsel %vm2335_vm6, %v1737_v18, %v539_v55  ;;  %v574_v46 = vand.u32 2147483647, %v2275_v22 }
  0x4d   : > { %v1739_v59 = vpop.eup %1738  ;;  %v576_v61 = vand.u32 2147483648, %v2275_v22  ;;  %1744 = vpow2.f32 %v2194_v30  ;;  %v548_v63 = vsel %vm545_vm7, %v547_v52, %v543_v60  ;;  %vm570_vm10 = vweird.f32 %v2275_v22 }
  0x4e   : > { %v551_v0 = vmul.f32 %v1739_v59, %v2271_v17  ;;  %v589_v1 = vand.u32 2147483647, %v2303_v34  ;;  %1425 = vst [vmem:[%s2291_s17 + $0x28] sm:$0xff] %v548_v63  ;;  %vm556_vm11 = vweird.f32 %v1739_v59  ;;  %vm585_vm12 = vweird.f32 %v2303_v34 }
  0x4f   : > { %v1741_v3 = vpop.eup %1740  ;;  %v591_v4 = vand.u32 2147483648, %v2303_v34  ;;  %1746 = vpow2.f32 %v2196_v31  ;;  %v1598_v6 = vmul.f32 -1.442695, %v154_v62  ;;  %vm2368_vm13 = vcmp.eq.f32.partialorder %v574_v46, 8.507059e+37  ;;  %vm2380_vm0 = vmor %vm555_vm8, %vm556_vm11 }
  0x50   : > { %v552_v30 = vsub.f32 1.0, %v551_v0  ;;  %v566_v5 = vmul.f32 %v1741_v3, %v2275_v22  ;;  %1748 = vpow2.f32 %v2207_v38  ;;  %v577_v9 = vor.u32 1.1754944e-38, %v576_v61  ;;  %v157_v38 = vld [vmem:[%s2168_s24 + $0x88] sm:$0xff] }
  0x51   : > { %1750 = vpow2.f32 %v1596_v53  ;;  %v1599_v10 = vmul.f32 -1.442695, %v155_v2  ;;  %vm571_vm14 = vweird.f32 %v1741_v3  ;;  %vm2372_vm15 = vcmp.eq.f32.partialorder %v589_v1, 8.507059e+37 }
  0x52   : > { %v1743_v11 = vpop.eup %1742  ;;  %v553_v12 = vmul.f32 %v1739_v59, %v552_v30  ;;  %v567_v13 = vsub.f32 1.0, %v566_v5  ;;  %v592_v18 = vor.u32 1.1754944e-38, %v591_v4  ;;  %1752 = vpow2.f32 %v1597_v56  ;;  %vm2392_vm1 = vmor %vm570_vm10, %vm571_vm14 }
  0x53   : > { %v1745_v14 = vpop.eup %1744  ;;  %v581_v16 = vmul.f32 %v1743_v11, %v2303_v34  ;;  %v1600_v19 = vmul.f32 -1.442695, %v156_v7  ;;  %1754 = vpow2.f32 %v1598_v6  ;;  %vm586_vm2 = vweird.f32 %v1743_v11 }
  0x54   : > { %v554_v21 = vadd.f32 %v1739_v59, %v553_v12  ;;  %v568_v23 = vmul.f32 %v1741_v3, %v567_v13  ;;  %v2386_v24 = vadd.f32 1.0, %v1745_v14  ;;  %1756 = vpow2.f32 %v1599_v10  ;;  %vm2415_vm4 = vmor %vm585_vm12, %vm586_vm2 }
  0x55   : > { %v1747_v26 = vpop.eup %1746  ;;  %v582_v27 = vsub.f32 1.0, %v581_v16  ;;  %v2396_v28 = vmul.f32 -1.442695, %v157_v38  ;;  %v2401_v22 = vmul.f32 -1.442695, %v158_v20 }
  0x56   : > { %v1749_v29 = vpop.eup %1748  ;;  %v558_v32 = vsel %vm2380_vm0, %v1739_v59, %v554_v21  ;;  %v569_v33 = vadd.f32 %v1741_v3, %v568_v23  ;;  %1758 = vrcp.f32 %v2386_v24  ;;  %v2405_v36 = vmul.f32 -1.442695, %v159_v25 }
  0x57   : > { %v1751_v35 = vpop.eup %1750  ;;  %v563_v39 = vsel %vm2346_vm9, %v562_v58, %v558_v32  ;;  %v583_v40 = vmul.f32 %v1743_v11, %v582_v27  ;;  %1760 = vpow2.f32 %v1600_v19  ;;  %v604_v45 = vand.u32 2147483647, %v2386_v24 }
  0x58   : > { %1426 = vst [vmem:[%s2291_s17 + $0x30] sm:$0xff] %v563_v39  ;;  %v573_v43 = vsel %vm2392_vm1, %v1741_v3, %v569_v33  ;;  %v2420_v37 = vadd.f32 1.0, %v1747_v26  ;;  %v2422_v47 = vadd.f32 1.0, %v1749_v29  ;;  %v1753_v48 = vpop.eup %1752  ;;  %v606_v51 = vand.u32 2147483648, %v2386_v24 }
  0x59   : > { %v578_v49 = vsel %vm2368_vm13, %v577_v9, %v573_v43  ;;  %v584_v50 = vadd.f32 %v1743_v11, %v583_v40  ;;  %v2427_v52 = vadd.f32 1.0, %v1751_v35  ;;  %v1755_v34 = vpop.eup %1754  ;;  %v2431_v53 = vmul.f32 -1.442695, %v160_v41 }
  0x5a   : > { %1427 = vst [vmem:[%s2291_s17 + $0x38] sm:$0xff] %v578_v49  ;;  %1762 = vrcp.f32 %v2420_v37  ;;  %v2433_v54 = vmul.f32 -1.442695, %v161_v42  ;;  %v1757_v55 = vpop.eup %1756  ;;  %vm600_vm3 = vweird.f32 %v2386_v24  ;;  %v619_v57 = vand.u32 2147483647, %v2420_v37 }
  0x5b   : > { %v588_v56 = vsel %vm2415_vm4, %v1743_v11, %v584_v50  ;;  %1764 = vrcp.f32 %v2422_v47  ;;  %v621_v60 = vand.u32 2147483648, %v2420_v37  ;;  %v634_v46 = vand.u32 2147483647, %v2422_v47 }
  0x5c   : > { %v1759_v58 = vpop.eup %1758  ;;  %v593_v59 = vsel %vm2372_vm15, %v592_v18, %v588_v56  ;;  %v636_v61 = vand.u32 2147483648, %v2422_v47  ;;  %vm2447_vm5 = vcmp.eq.f32.partialorder %v604_v45, 8.507059e+37  ;;  %v607_v1 = vor.u32 1.1754944e-38, %v606_v51 }
  0x5d   : > { %v1761_v62 = vpop.eup %1760  ;;  %1428 = vst [vmem:[%s2291_s17 + $0x40] sm:$0xff] %v593_v59  ;;  %v596_v63 = vmul.f32 %v1759_v58, %v2386_v24  ;;  %1766 = vrcp.f32 %v2427_v52  ;;  %vm615_vm6 = vweird.f32 %v2420_v37  ;;  %vm630_vm7 = vweird.f32 %v2422_v47 }
  0x5e   : > { %v649_v2 = vand.u32 2147483647, %v2427_v52  ;;  %v651_v3 = vand.u32 2147483648, %v2427_v52  ;;  %vm601_vm8 = vweird.f32 %v1759_v58  ;;  %v2456_v30 = vadd.f32 1.0, %v1753_v48 }
  0x5f   : > { %v597_v4 = vsub.f32 1.0, %v596_v63  ;;  %v2458_v5 = vadd.f32 1.0, %v1755_v34  ;;  %vm2460_vm9 = vcmp.eq.f32.partialorder %v619_v57, 8.507059e+37  ;;  %v622_v8 = vor.u32 1.1754944e-38, %v621_v60  ;;  %vm2473_vm12 = vmor %vm600_vm3, %vm601_vm8 }
  0x60   : > { %v1763_v6 = vpop.eup %1762  ;;  %vm2464_vm10 = vcmp.eq.f32.partialorder %v634_v46, 8.507059e+37  ;;  %v637_v10 = vor.u32 1.1754944e-38, %v636_v61  ;;  %vm645_vm11 = vweird.f32 %v2427_v52  ;;  %1768 = vrcp.f32 %v2456_v30 }
  0x61   : > { %v1765_v11 = vpop.eup %1764  ;;  %v598_v12 = vmul.f32 %v1759_v58, %v597_v4  ;;  %v611_v13 = vmul.f32 %v1763_v6, %v2420_v37  ;;  %vm2478_vm13 = vcmp.eq.f32.partialorder %v649_v2, 8.507059e+37  ;;  %v652_v15 = vor.u32 1.1754944e-38, %v651_v3 }
  0x62   : > { %v626_v38 = vmul.f32 %v1765_v11, %v2422_v47  ;;  %v2482_v16 = vadd.f32 1.0, %v1757_v55  ;;  %vm616_vm14 = vweird.f32 %v1763_v6  ;;  %1770 = vrcp.f32 %v2458_v5 }
  0x63   : > { %v1767_v18 = vpop.eup %1766  ;;  %v599_v19 = vadd.f32 %v1759_v58, %v598_v12  ;;  %v612_v20 = vsub.f32 1.0, %v611_v13  ;;  %vm631_vm15 = vweird.f32 %v1765_v11  ;;  %v664_v24 = vand.u32 2147483647, %v2456_v30  ;;  %vm2495_vm0 = vmor %vm615_vm6, %vm616_vm14  ;;  %v162_v12 = vld [vmem:[%s2168_s24 + $0xb0] sm:$0xff] }
  0x64   : > { %v627_v21 = vsub.f32 1.0, %v626_v38  ;;  %v641_v23 = vmul.f32 %v1767_v18, %v2427_v52  ;;  %v666_v17 = vand.u32 2147483648, %v2456_v30  ;;  %1772 = vpow2.f32 %v2396_v28  ;;  %vm2503_vm2 = vmor %vm630_vm7, %vm631_vm15 }
  0x65   : > { %v603_v25 = vsel %vm2473_vm12, %v1759_v58, %v599_v19  ;;  %v613_v26 = vmul.f32 %v1763_v6, %v612_v20  ;;  %vm646_vm1 = vweird.f32 %v1767_v18  ;;  %vm660_vm4 = vweird.f32 %v2456_v30 }
  0x66   : > { %v608_v27 = vsel %vm2447_vm5, %v607_v1, %v603_v25  ;;  %v628_v32 = vmul.f32 %v1765_v11, %v627_v21  ;;  %v642_v33 = vsub.f32 1.0, %v641_v23  ;;  %v1769_v35 = vpop.eup %1768  ;;  %1774 = vrcp.f32 %v2482_v16  ;;  %vm2520_vm5 = vmor %vm645_vm11, %vm646_vm1  ;;  %v163_v23 = vld [vmem:[%s2168_s24 + $0xb8] sm:$0xff] }
  0x67   : > { %1429 = vst [vmem:[%s2291_s17 + $0x48] sm:$0xff] %v608_v27  ;;  %v614_v39 = vadd.f32 %v1763_v6, %v613_v26  ;;  %v2509_v40 = vadd.f32 1.0, %v1761_v62  ;;  %v656_v43 = vmul.f32 %v1769_v35, %v2456_v30  ;;  %vm2512_vm3 = vcmp.eq.f32.partialorder %v664_v24, 8.507059e+37  ;;  %v164_v24 = vld [vmem:[%s2168_s24 + $0xc0] sm:$0xff] }
  0x68   : > { %v629_v41 = vadd.f32 %v1765_v11, %v628_v32  ;;  %v643_v42 = vmul.f32 %v1767_v18, %v642_v33  ;;  %v1771_v45 = vpop.eup %1770  ;;  %vm661_vm6 = vweird.f32 %v1769_v35  ;;  %v667_v48 = vor.u32 1.1754944e-38, %v666_v17 }
  0x69   : > { %v618_v37 = vsel %vm2495_vm0, %v1763_v6, %v614_v39  ;;  %vm675_vm7 = vweird.f32 %v2458_v5  ;;  %v657_v34 = vsub.f32 1.0, %v656_v43  ;;  %v671_v56 = vmul.f32 %v1771_v45, %v2458_v5  ;;  %v165_v39 = vld [vmem:[%s2168_s24 + $0xc8] sm:$0xff] }
  0x6a   : > { %v623_v49 = vsel %vm2460_vm9, %v622_v8, %v618_v37  ;;  %v633_v50 = vsel %vm2503_vm2, %v1765_v11, %v629_v41  ;;  %v644_v51 = vadd.f32 %v1767_v18, %v643_v42  ;;  %v1773_v55 = vpop.eup %1772  ;;  %v679_v57 = vand.u32 2147483647, %v2458_v5  ;;  %vm2545_vm9 = vmor %vm660_vm4, %vm661_vm6 }
  0x6b   : > { %1430 = vst [vmem:[%s2291_s17 + $0x50] sm:$0xff] %v623_v49  ;;  %v638_v52 = vsel %vm2464_vm10, %v637_v10, %v633_v50  ;;  %v681_v58 = vand.u32 2147483648, %v2458_v5  ;;  %v658_v60 = vmul.f32 %v1769_v35, %v657_v34  ;;  %vm690_vm8 = vweird.f32 %v2482_v16  ;;  %v167_v34 = vld [vmem:[%s2168_s24 + $0xd8] sm:$0xff] }
  0x6c   : > { %1431 = vst [vmem:[%s2291_s17 + $0x58] sm:$0xff] %v638_v52  ;;  %v648_v59 = vsel %vm2520_vm5, %v1767_v18, %v644_v51  ;;  %1776 = vrcp.f32 %v2509_v40  ;;  %v1775_v46 = vpop.eup %1774  ;;  %v672_v63 = vsub.f32 1.0, %v671_v56  ;;  %vm676_vm10 = vweird.f32 %v1771_v45 }
  0x6d   : > { %v653_v61 = vsel %vm2478_vm13, %v652_v15, %v648_v59  ;;  %v694_v0 = vand.u32 2147483647, %v2482_v16  ;;  %v659_v1 = vadd.f32 %v1769_v35, %v658_v60  ;;  %v686_v2 = vmul.f32 %v1775_v46, %v2482_v16  ;;  %vm2564_vm12 = vmor %vm675_vm7, %vm676_vm10 }
  0x6e   : > { %1432 = vst [vmem:[%s2291_s17 + $0x60] sm:$0xff] %v653_v61  ;;  %v696_v3 = vand.u32 2147483648, %v2482_v16  ;;  %v709_v4 = vand.u32 2147483647, %v2509_v40  ;;  %v673_v6 = vmul.f32 %v1771_v45, %v672_v63  ;;  %vm2554_vm11 = vcmp.eq.f32.partialorder %v679_v57, 8.507059e+37 }
  0x6f   : > { %v682_v7 = vor.u32 1.1754944e-38, %v681_v58  ;;  %v2558_v8 = vadd.f32 1.0, %v1773_v55  ;;  %v663_v9 = vsel %vm2545_vm9, %v1769_v35, %v659_v1  ;;  %v687_v11 = vsub.f32 1.0, %v686_v2  ;;  %v168_v58 = vld [vmem:[%s2168_s24 + $0xe0] sm:$0xff] }
  0x70   : > { %vm691_vm13 = vweird.f32 %v1775_v46  ;;  %1778 = vpow2.f32 %v2401_v22  ;;  %v668_v13 = vsel %vm2512_vm3, %v667_v48, %v663_v9  ;;  %v674_v31 = vadd.f32 %v1771_v45, %v673_v6  ;;  %v166_v48 = vld [vmem:[%s2168_s24 + $0xd0] sm:$0xff] }
  0x71   : > { %vm2572_vm14 = vcmp.eq.f32.partialorder %v694_v0, 8.507059e+37  ;;  %1780 = vrcp.f32 %v2558_v8  ;;  %1433 = vst [vmem:[%s2291_s17 + $0x68] sm:$0xff] %v668_v13  ;;  %v688_v14 = vmul.f32 %v1775_v46, %v687_v11  ;;  %v697_v15 = vor.u32 1.1754944e-38, %v696_v3  ;;  %vm2587_vm1 = vmor %vm690_vm8, %vm691_vm13 }
  0x72   : > { %v1777_v5 = vpop.eup %1776  ;;  %vm705_vm15 = vweird.f32 %v2509_v40  ;;  %vm2579_vm0 = vcmp.eq.f32.partialorder %v709_v4, 8.507059e+37  ;;  %v678_v18 = vsel %vm2564_vm12, %v1771_v45, %v674_v31  ;;  %1782 = vpow2.f32 %v2405_v36 }
  0x73   : > { %v701_v20 = vmul.f32 %v1777_v5, %v2509_v40  ;;  %v1606_v21 = vmul.f32 -1.442695, %v162_v12  ;;  %v683_v25 = vsel %vm2554_vm11, %v682_v7, %v678_v18  ;;  %v689_v26 = vadd.f32 %v1775_v46, %v688_v14 }
  0x74   : > { %v711_v17 = vand.u32 2147483648, %v2509_v40  ;;  %v724_v16 = vand.u32 2147483647, %v2558_v8  ;;  %1434 = vst [vmem:[%s2291_s17 + $0x70] sm:$0xff] %v683_v25  ;;  %vm706_vm2 = vweird.f32 %v1777_v5  ;;  %v726_v29 = vand.u32 2147483648, %v2558_v8 }
  0x75   : > { %v702_v27 = vsub.f32 1.0, %v701_v20  ;;  %1784 = vpow2.f32 %v2431_v53  ;;  %v693_v32 = vsel %vm2587_vm1, %v1775_v46, %v689_v26  ;;  %v1607_v33 = vmul.f32 -1.442695, %v163_v23  ;;  %vm2614_vm4 = vmor %vm705_vm15, %vm706_vm2 }
  0x76   : > { %v1779_v36 = vpop.eup %1778  ;;  %1786 = vpow2.f32 %v2433_v54  ;;  %v1608_v35 = vmul.f32 -1.442695, %v164_v24  ;;  %v698_v41 = vsel %vm2572_vm14, %v697_v15, %v693_v32  ;;  %v712_v54 = vor.u32 1.1754944e-38, %v711_v17 }
  0x77   : > { %v1781_v28 = vpop.eup %1780  ;;  %v703_v42 = vmul.f32 %v1777_v5, %v702_v27  ;;  %v2608_v43 = vadd.f32 1.0, %v1779_v36  ;;  %1788 = vpow2.f32 %v1606_v21  ;;  %1435 = vst [vmem:[%s2291_s17 + $0x78] sm:$0xff] %v698_v41  ;;  %vm720_vm3 = vweird.f32 %v2558_v8 }
  0x78   : > { %v716_v44 = vmul.f32 %v1781_v28, %v2558_v8  ;;  %vm2620_vm5 = vcmp.eq.f32.partialorder %v724_v16, 8.507059e+37  ;;  %v1783_v37 = vpop.eup %1782  ;;  %vm721_vm6 = vweird.f32 %v1781_v28  ;;  %v1609_v40 = vmul.f32 -1.442695, %v165_v39 }
  0x79   : > { %v704_v47 = vadd.f32 %v1777_v5, %v703_v42  ;;  %1790 = vrcp.f32 %v2608_v43  ;;  %v739_v50 = vand.u32 2147483647, %v2608_v43  ;;  %v2627_v51 = vadd.f32 1.0, %v1783_v37  ;;  %vm2641_vm7 = vmor %vm720_vm3, %vm721_vm6 }
  0x7a   : > { %v717_v49 = vsub.f32 1.0, %v716_v44  ;;  %1792 = vpow2.f32 %v1607_v33  ;;  %v727_v56 = vor.u32 1.1754944e-38, %v726_v29  ;;  %v741_v57 = vand.u32 2147483648, %v2608_v43 }
  0x7b   : > { %v1785_v55 = vpop.eup %1784  ;;  %v708_v52 = vsel %vm2614_vm4, %v1777_v5, %v704_v47  ;;  %1794 = vpow2.f32 %v1608_v35  ;;  %v1610_v61 = vmul.f32 -1.442695, %v166_v48  ;;  %vm735_vm8 = vweird.f32 %v2608_v43 }
  0x7c   : > { %v1787_v59 = vpop.eup %1786  ;;  %v713_v60 = vsel %vm2579_vm0, %v712_v54, %v708_v52  ;;  %v718_v46 = vmul.f32 %v1781_v28, %v717_v49  ;;  %1796 = vrcp.f32 %v2627_v51  ;;  %v2646_v0 = vadd.f32 1.0, %v1785_v55  ;;  %v173_v52 = vld [vmem:[%s2168_s24 + $0x108] sm:$0xff] }
  0x7d   : > { %v1789_v62 = vpop.eup %1788  ;;  %1436 = vst [vmem:[%s2291_s17 + $0x80] sm:$0xff] %v713_v60  ;;  %1798 = vpow2.f32 %v1609_v40  ;;  %v2648_v1 = vmul.f32 -1.442695, %v167_v34  ;;  %vm2650_vm9 = vcmp.eq.f32.partialorder %v739_v50, 8.507059e+37  ;;  %v754_v4 = vand.u32 2147483647, %v2627_v51 }
  0x7e   : > { %v719_v2 = vadd.f32 %v1781_v28, %v718_v46  ;;  %v2655_v6 = vadd.f32 1.0, %v1787_v59  ;;  %v2657_v30 = vmul.f32 -1.442695, %v168_v58  ;;  %v742_v8 = vor.u32 1.1754944e-38, %v741_v57 }
  0x7f   : > { %v1791_v7 = vpop.eup %1790  ;;  %v756_v9 = vand.u32 2147483648, %v2627_v51  ;;  %1800 = vrcp.f32 %v2646_v0  ;;  %v2661_v10 = vadd.f32 1.0, %v1789_v62  ;;  %v769_v31 = vand.u32 2147483647, %v2646_v0 }
  0x80   : > { %v1793_v11 = vpop.eup %1792  ;;  %v723_v12 = vsel %vm2641_vm7, %v1781_v28, %v719_v2  ;;  %v731_v13 = vmul.f32 %v1791_v7, %v2608_v43  ;;  %1802 = vpow2.f32 %v1610_v61  ;;  %vm750_vm10 = vweird.f32 %v2627_v51 }
  0x81   : > { %v1795_v38 = vpop.eup %1794  ;;  %v728_v5 = vsel %vm2620_vm5, %v727_v56, %v723_v12  ;;  %v771_v14 = vand.u32 2147483648, %v2646_v0  ;;  %1804 = vrcp.f32 %v2655_v6  ;;  %vm736_vm11 = vweird.f32 %v1791_v7 }
  0x82   : > { %v1797_v15 = vpop.eup %1796  ;;  %1437 = vst [vmem:[%s2291_s17 + $0x88] sm:$0xff] %v728_v5  ;;  %v732_v22 = vsub.f32 1.0, %v731_v13  ;;  %vm2673_vm12 = vcmp.eq.f32.partialorder %v754_v4, 8.507059e+37  ;;  %v784_v19 = vand.u32 2147483647, %v2655_v6  ;;  %v757_v23 = vor.u32 1.1754944e-38, %v756_v9  ;;  %vm2691_vm0 = vmor %vm735_vm8, %vm736_vm11 }
  0x83   : > { %v2678_v20 = vpop.eup %1798  ;;  %v746_v21 = vmul.f32 %v1797_v15, %v2627_v51  ;;  %vm765_vm13 = vweird.f32 %v2646_v0  ;;  %1806 = vrcp.f32 %v2661_v10  ;;  %vm2683_vm14 = vcmp.eq.f32.partialorder %v769_v31, 8.507059e+37 }
  0x84   : > { %v733_v24 = vmul.f32 %v1791_v7, %v732_v22  ;;  %vm780_vm15 = vweird.f32 %v2655_v6  ;;  %v786_v26 = vand.u32 2147483648, %v2655_v6  ;;  %vm751_vm1 = vweird.f32 %v1797_v15 }
  0x85   : > { %v1801_v17 = vpop.eup %1800  ;;  %v747_v27 = vsub.f32 1.0, %v746_v21  ;;  %v772_v29 = vor.u32 1.1754944e-38, %v771_v14  ;;  %v2695_v36 = vadd.f32 1.0, %v1793_v11  ;;  %vm2698_vm2 = vcmp.eq.f32.partialorder %v784_v19, 8.507059e+37  ;;  %vm2711_vm3 = vmor %vm750_vm10, %vm751_vm1 }
  0x86   : > { %v1803_v32 = vpop.eup %1802  ;;  %v734_v33 = vadd.f32 %v1791_v7, %v733_v24  ;;  %v761_v35 = vmul.f32 %v1801_v17, %v2646_v0  ;;  %vm795_vm4 = vweird.f32 %v2661_v10  ;;  %v799_v42 = vand.u32 2147483647, %v2661_v10 }
  0x87   : > { %v1805_v28 = vpop.eup %1804  ;;  %v748_v41 = vmul.f32 %v1797_v15, %v747_v27  ;;  %1808 = vrcp.f32 %v2695_v36  ;;  %v2705_v43 = vadd.f32 1.0, %v1795_v38  ;;  %vm766_vm5 = vweird.f32 %v1801_v17  ;;  %v170_v27 = vld [vmem:[%s2168_s24 + $0xf0] sm:$0xff] }
  0x88   : > { %v738_v53 = vsel %vm2691_vm0, %v1791_v7, %v734_v33  ;;  %v762_v44 = vsub.f32 1.0, %v761_v35  ;;  %v776_v45 = vmul.f32 %v1805_v28, %v2655_v6  ;;  %vm781_vm6 = vweird.f32 %v1805_v28  ;;  %vm2726_vm7 = vmor %vm765_vm13, %vm766_vm5  ;;  %v171_v33 = vld [vmem:[%s2168_s24 + $0xf8] sm:$0xff] }
  0x89   : > { %v1807_v37 = vpop.eup %1806  ;;  %v743_v47 = vsel %vm2650_vm9, %v742_v8, %v738_v53  ;;  %v749_v40 = vadd.f32 %v1797_v15, %v748_v41  ;;  %v801_v48 = vand.u32 2147483648, %v2661_v10  ;;  %v814_v34 = vand.u32 2147483647, %v2695_v36  ;;  %vm2738_vm9 = vmor %vm780_vm15, %vm781_vm6 }
  0x8a   : > { %1438 = vst [vmem:[%s2291_s17 + $0x90] sm:$0xff] %v743_v47  ;;  %v763_v49 = vmul.f32 %v1801_v17, %v762_v44  ;;  %v777_v50 = vsub.f32 1.0, %v776_v45  ;;  %v791_v51 = vmul.f32 %v1807_v37, %v2661_v10  ;;  %vm796_vm8 = vweird.f32 %v1807_v37  ;;  %v169_v10 = vld [vmem:[%s2168_s24 + $0xe8] sm:$0xff] }
  0x8b   : > { %v753_v55 = vsel %vm2711_vm3, %v1797_v15, %v749_v40  ;;  %v816_v56 = vand.u32 2147483648, %v2695_v36  ;;  %1810 = vrcp.f32 %v2705_v43  ;;  %v787_v62 = vor.u32 1.1754944e-38, %v786_v26 }
  0x8c   : > { %v758_v57 = vsel %vm2673_vm12, %v757_v23, %v753_v55  ;;  %v764_v58 = vadd.f32 %v1801_v17, %v763_v49  ;;  %v778_v59 = vmul.f32 %v1805_v28, %v777_v50  ;;  %v792_v60 = vsub.f32 1.0, %v791_v51  ;;  %vm2755_vm12 = vmor %vm795_vm4, %vm796_vm8 }
  0x8d   : > { %v1809_v46 = vpop.eup %1808  ;;  %1439 = vst [vmem:[%s2291_s17 + $0x98] sm:$0xff] %v758_v57  ;;  %vm2742_vm10 = vcmp.eq.f32.partialorder %v799_v42, 8.507059e+37  ;;  %v802_v0 = vor.u32 1.1754944e-38, %v801_v48  ;;  %vm810_vm11 = vweird.f32 %v2695_v36  ;;  %vm2759_vm15 = vcmp.eq.f32.partialorder %v814_v34, 8.507059e+37  ;;  %v177_v34 = vld [vmem:[%s2168_s24 + $0x128] sm:$0xff] }
  0x8e   : > { %v768_v2 = vsel %vm2726_vm7, %v1801_v17, %v764_v58  ;;  %v779_v3 = vadd.f32 %v1805_v28, %v778_v59  ;;  %v793_v4 = vmul.f32 %v1807_v37, %v792_v60  ;;  %v806_v6 = vmul.f32 %v1809_v46, %v2695_v36 }
  0x8f   : > { %v773_v7 = vsel %vm2683_vm14, %v772_v29, %v768_v2  ;;  %vm811_vm13 = vweird.f32 %v1809_v46  ;;  %v817_v11 = vor.u32 1.1754944e-38, %v816_v56  ;;  %v2767_v38 = vadd.f32 1.0, %v2678_v20  ;;  %v174_v56 = vld [vmem:[%s2168_s24 + $0x110] sm:$0xff] }
  0x90   : > { %1440 = vst [vmem:[%s2291_s17 + $0xa0] sm:$0xff] %v773_v7  ;;  %v783_v12 = vsel %vm2738_vm9, %v1805_v28, %v779_v3  ;;  %v794_v13 = vadd.f32 %v1807_v37, %v793_v4  ;;  %v807_v31 = vsub.f32 1.0, %v806_v6  ;;  %v831_v15 = vand.u32 2147483648, %v2705_v43  ;;  %vm2786_vm0 = vmor %vm810_vm11, %vm811_vm13 }
  0x91   : > { %v1811_v5 = vpop.eup %1810  ;;  %v788_v14 = vsel %vm2698_vm2, %v787_v62, %v783_v12  ;;  %v2773_v22 = vadd.f32 1.0, %v1803_v32  ;;  %1812 = vpow2.f32 %v2648_v1  ;;  %vm825_vm14 = vweird.f32 %v2705_v43  ;;  %v175_v62 = vld [vmem:[%s2168_s24 + $0x118] sm:$0xff] }
  0x92   : > { %1441 = vst [vmem:[%s2291_s17 + $0xa8] sm:$0xff] %v788_v14  ;;  %v798_v18 = vsel %vm2755_vm12, %v1807_v37, %v794_v13  ;;  %v808_v19 = vmul.f32 %v1809_v46, %v807_v31  ;;  %v821_v20 = vmul.f32 %v1811_v5, %v2705_v43  ;;  %v829_v1 = vand.u32 2147483647, %v2705_v43  ;;  %v172_v37 = vld [vmem:[%s2168_s24 + $0x100] sm:$0xff] }
  0x93   : > { %v803_v21 = vsel %vm2742_vm10, %v802_v0, %v798_v18  ;;  %1814 = vrcp.f32 %v2767_v38  ;;  %v1613_v24 = vmul.f32 -1.442695, %v169_v10  ;;  %vm826_vm1 = vweird.f32 %v1811_v5 }
  0x94   : > { %1442 = vst [vmem:[%s2291_s17 + $0xb0] sm:$0xff] %v803_v21  ;;  %v809_v25 = vadd.f32 %v1809_v46, %v808_v19  ;;  %v822_v26 = vsub.f32 1.0, %v821_v20  ;;  %1816 = vrcp.f32 %v2773_v22  ;;  %v832_v17 = vor.u32 1.1754944e-38, %v831_v15  ;;  %vm2805_vm2 = vmor %vm825_vm14, %vm826_vm1 }
  0x95   : > { %v844_v16 = vand.u32 2147483647, %v2767_v38  ;;  %v846_v32 = vand.u32 2147483648, %v2767_v38  ;;  %1818 = vpow2.f32 %v2657_v30  ;;  %v859_v41 = vand.u32 2147483647, %v2773_v22 }
  0x96   : > { %v813_v29 = vsel %vm2786_vm0, %v1809_v46, %v809_v25  ;;  %v823_v36 = vmul.f32 %v1811_v5, %v822_v26  ;;  %v861_v42 = vand.u32 2147483648, %v2773_v22  ;;  %1820 = vpow2.f32 %v1613_v24 }
  0x97   : > { %v1813_v35 = vpop.eup %1812  ;;  %v818_v39 = vsel %vm2759_vm15, %v817_v11, %v813_v29  ;;  %vm830_vm4 = vcmp.eq.f32.partialorder %v829_v1, 8.507059e+37  ;;  %v1614_v54 = vmul.f32 -1.442695, %v170_v27  ;;  %vm840_vm3 = vweird.f32 %v2767_v38 }
  0x98   : > { %1443 = vst [vmem:[%s2291_s17 + $0xb8] sm:$0xff] %v818_v39  ;;  %v824_v53 = vadd.f32 %v1811_v5, %v823_v36  ;;  %v2812_v30 = vadd.f32 1.0, %v1813_v35  ;;  %vm2815_vm5 = vcmp.eq.f32.partialorder %v844_v16, 8.507059e+37  ;;  %vm855_vm6 = vweird.f32 %v2773_v22 }
  0x99   : > { %v1815_v44 = vpop.eup %1814  ;;  %v1615_v45 = vmul.f32 -1.442695, %v171_v33  ;;  %v847_v49 = vor.u32 1.1754944e-38, %v846_v32  ;;  %vm2826_vm7 = vcmp.eq.f32.partialorder %v859_v41, 8.507059e+37  ;;  %v862_v55 = vor.u32 1.1754944e-38, %v861_v42 }
  0x9a   : > { %v1817_v47 = vpop.eup %1816  ;;  %v828_v40 = vsel %vm2805_vm2, %v1811_v5, %v824_v53  ;;  %v836_v48 = vmul.f32 %v1815_v44, %v2767_v38  ;;  %1822 = vrcp.f32 %v2812_v30  ;;  %vm841_vm8 = vweird.f32 %v1815_v44 }
  0x9b   : > { %v833_v50 = vsel %vm830_vm4, %v832_v17, %v828_v40  ;;  %v851_v51 = vmul.f32 %v1817_v47, %v2773_v22  ;;  %v1819_v57 = vpop.eup %1818  ;;  %1824 = vpow2.f32 %v1614_v54  ;;  %v2833_v59 = vmul.f32 -1.442695, %v172_v37  ;;  %vm2844_vm10 = vmor %vm840_vm3, %vm841_vm8  ;;  %v176_v54 = vld [vmem:[%s2168_s24 + $0x120] sm:$0xff] }
  0x9c   : > { %1444 = vst [vmem:[%s2291_s17 + $0xc0] sm:$0xff] %v833_v50  ;;  %v837_v58 = vsub.f32 1.0, %v836_v48  ;;  %v1821_v60 = vpop.eup %1820  ;;  %vm856_vm9 = vweird.f32 %v1817_v47  ;;  %v2835_v61 = vadd.f32 1.0, %v1819_v57  ;;  %1826 = vpow2.f32 %v1615_v45 }
  0x9d   : > { %v852_v46 = vsub.f32 1.0, %v851_v51  ;;  %v2838_v0 = vadd.f32 1.0, %v1821_v60  ;;  %v1617_v2 = vmul.f32 -1.442695, %v173_v52  ;;  %v2840_v3 = vmul.f32 -1.442695, %v174_v56  ;;  %vm2854_vm12 = vmor %vm855_vm6, %vm856_vm9 }
  0x9e   : > { %v838_v63 = vmul.f32 %v1815_v44, %v837_v58  ;;  %vm870_vm11 = vweird.f32 %v2812_v30  ;;  %v874_v7 = vand.u32 2147483647, %v2812_v30  ;;  %1828 = vrcp.f32 %v2835_v61 }
  0x9f   : > { %v853_v6 = vmul.f32 %v1817_v47, %v852_v46  ;;  %v876_v12 = vand.u32 2147483648, %v2812_v30  ;;  %1830 = vrcp.f32 %v2838_v0  ;;  %v2860_v13 = vmul.f32 -1.442695, %v175_v62  ;;  %v178_v46 = vld [vmem:[%s2168_s24 + $0x130] sm:$0xff] }
  0xa0   : > { %v1823_v8 = vpop.eup %1822  ;;  %v839_v9 = vadd.f32 %v1815_v44, %v838_v63  ;;  %v889_v10 = vand.u32 2147483647, %v2835_v61  ;;  %v891_v5 = vand.u32 2147483648, %v2835_v61  ;;  %v904_v22 = vand.u32 2147483647, %v2838_v0 }
  0xa1   : > { %v854_v31 = vadd.f32 %v1817_v47, %v853_v6  ;;  %v866_v38 = vmul.f32 %v1823_v8, %v2812_v30  ;;  %v1825_v14 = vpop.eup %1824  ;;  %vm871_vm13 = vweird.f32 %v1823_v8  ;;  %v906_v18 = vand.u32 2147483648, %v2838_v0 }
  0xa2   : > { %v843_v15 = vsel %vm2844_vm10, %v1815_v44, %v839_v9  ;;  %v1827_v19 = vpop.eup %1826  ;;  %v2873_v1 = vadd.f32 1.0, %v1825_v14  ;;  %vm2878_vm15 = vcmp.eq.f32.partialorder %v874_v7, 8.507059e+37  ;;  %v877_v26 = vor.u32 1.1754944e-38, %v876_v12  ;;  %vm2891_vm1 = vmor %vm870_vm11, %vm871_vm13 }
  0xa3   : > { %v848_v20 = vsel %vm2815_vm5, %v847_v49, %v843_v15  ;;  %v858_v21 = vsel %vm2854_vm12, %v1817_v47, %v854_v31  ;;  %v867_v23 = vsub.f32 1.0, %v866_v38  ;;  %v2882_v17 = vadd.f32 1.0, %v1827_v19  ;;  %v179_v19 = vld [vmem:[%s2168_s24 + $0x138] sm:$0xff] }
  0xa4   : > { %1445 = vst [vmem:[%s2291_s17 + $0xc8] sm:$0xff] %v848_v20  ;;  %v863_v24 = vsel %vm2826_vm7, %v862_v55, %v858_v21  ;;  %v1829_v16 = vpop.eup %1828  ;;  %vm885_vm14 = vweird.f32 %v2835_v61  ;;  %vm900_vm0 = vweird.f32 %v2838_v0  ;;  %1832 = vrcp.f32 %v2873_v1 }
  0xa5   : > { %1446 = vst [vmem:[%s2291_s17 + $0xd0] sm:$0xff] %v863_v24  ;;  %v868_v27 = vmul.f32 %v1823_v8, %v867_v23  ;;  %v1831_v29 = vpop.eup %1830  ;;  %v881_v32 = vmul.f32 %v1829_v16, %v2835_v61  ;;  %vm2896_vm2 = vcmp.eq.f32.partialorder %v889_v10, 8.507059e+37  ;;  %v892_v35 = vor.u32 1.1754944e-38, %v891_v5 }
  0xa6   : > { %1834 = vrcp.f32 %v2882_v17  ;;  %v896_v28 = vmul.f32 %v1831_v29, %v2838_v0  ;;  %vm2902_vm4 = vcmp.eq.f32.partialorder %v904_v22, 8.507059e+37  ;;  %v907_v42 = vor.u32 1.1754944e-38, %v906_v18 }
  0xa7   : > { %v869_v39 = vadd.f32 %v1823_v8, %v868_v27  ;;  %v882_v53 = vsub.f32 1.0, %v881_v32  ;;  %vm886_vm3 = vweird.f32 %v1829_v16  ;;  %vm915_vm5 = vweird.f32 %v2873_v1 }
  0xa8   : > { %v919_v30 = vand.u32 2147483647, %v2873_v1  ;;  %v897_v43 = vsub.f32 1.0, %v896_v28  ;;  %vm901_vm6 = vweird.f32 %v1831_v29  ;;  %1836 = vpow2.f32 %v2833_v59  ;;  %vm2918_vm7 = vmor %vm885_vm14, %vm886_vm3 }
  0xa9   : > { %v873_v44 = vsel %vm2891_vm1, %v1823_v8, %v869_v39  ;;  %v883_v37 = vmul.f32 %v1829_v16, %v882_v53  ;;  %v921_v47 = vand.u32 2147483648, %v2873_v1  ;;  %1838 = vpow2.f32 %v1617_v2  ;;  %vm2928_vm9 = vmor %vm900_vm0, %vm901_vm6 }
  0xaa   : > { %v878_v45 = vsel %vm2878_vm15, %v877_v26, %v873_v44  ;;  %v1833_v40 = vpop.eup %1832  ;;  %v898_v49 = vmul.f32 %v1831_v29, %v897_v43  ;;  %vm930_vm8 = vweird.f32 %v2882_v17  ;;  %v934_v50 = vand.u32 2147483647, %v2882_v17 }
  0xab   : > { %1447 = vst [vmem:[%s2291_s17 + $0xd8] sm:$0xff] %v878_v45  ;;  %v1620_v51 = vmul.f32 -1.442695, %v176_v54  ;;  %v884_v52 = vadd.f32 %v1829_v16, %v883_v37  ;;  %v911_v57 = vmul.f32 %v1833_v40, %v2873_v1  ;;  %v936_v58 = vand.u32 2147483648, %v2882_v17  ;;  %v180_v1 = vld [vmem:[%s2168_s24 + $0x140] sm:$0xff] }
  0xac   : > { %v1835_v55 = vpop.eup %1834  ;;  %1840 = vpow2.f32 %v2840_v3  ;;  %v899_v59 = vadd.f32 %v1831_v29, %v898_v49  ;;  %vm916_vm10 = vweird.f32 %v1833_v40  ;;  %v1621_v63 = vmul.f32 -1.442695, %v177_v34 }
  0xad   : > { %v926_v60 = vmul.f32 %v1835_v55, %v2882_v17  ;;  %1842 = vpow2.f32 %v2860_v13  ;;  %v888_v61 = vsel %vm2918_vm7, %v1829_v16, %v884_v52  ;;  %v912_v62 = vsub.f32 1.0, %v911_v57  ;;  %vm2953_vm12 = vmor %vm915_vm5, %vm916_vm10 }
  0xae   : > { %vm931_vm11 = vweird.f32 %v1835_v55  ;;  %v1837_v0 = vpop.eup %1836  ;;  %v893_v2 = vsel %vm2896_vm2, %v892_v35, %v888_v61  ;;  %v903_v3 = vsel %vm2928_vm9, %v1831_v29, %v899_v59  ;;  %1844 = vpow2.f32 %v1620_v51  ;;  %v185_v51 = vld [vmem:[%s2168_s24 + $0x168] sm:$0xff] }
  0xaf   : > { %v927_v4 = vsub.f32 1.0, %v926_v60  ;;  %v1839_v6 = vpop.eup %1838  ;;  %1448 = vst [vmem:[%s2291_s17 + $0xe0] sm:$0xff] %v893_v2  ;;  %v908_v7 = vsel %vm2902_vm4, %v907_v42, %v903_v3  ;;  %v913_v8 = vmul.f32 %v1833_v40, %v912_v62  ;;  %v2947_v9 = vadd.f32 1.0, %v1837_v0  ;;  %vm2962_vm15 = vmor %vm930_vm8, %vm931_vm11 }
  0xb0   : > { %v1622_v11 = vmul.f32 -1.442695, %v178_v46  ;;  %1449 = vst [vmem:[%s2291_s17 + $0xe8] sm:$0xff] %v908_v7  ;;  %v922_v13 = vor.u32 1.1754944e-38, %v921_v47  ;;  %v2957_v38 = vadd.f32 1.0, %v1839_v6  ;;  %1846 = vpow2.f32 %v1621_v63  ;;  %v182_v7 = vld [vmem:[%s2168_s24 + $0x150] sm:$0xff] }
  0xb1   : > { %v928_v31 = vmul.f32 %v1835_v55, %v927_v4  ;;  %v914_v5 = vadd.f32 %v1833_v40, %v913_v8  ;;  %vm920_vm13 = vcmp.eq.f32.partialorder %v919_v30, 8.507059e+37  ;;  %v937_v15 = vor.u32 1.1754944e-38, %v936_v58 }
  0xb2   : > { %v1841_v10 = vpop.eup %1840  ;;  %1848 = vrcp.f32 %v2947_v9  ;;  %vm935_vm14 = vcmp.eq.f32.partialorder %v934_v50, 8.507059e+37  ;;  %v949_v21 = vand.u32 2147483647, %v2947_v9  ;;  %v951_v23 = vand.u32 2147483648, %v2947_v9 }
  0xb3   : > { %v1843_v22 = vpop.eup %1842  ;;  %v929_v18 = vadd.f32 %v1835_v55, %v928_v31  ;;  %1850 = vrcp.f32 %v2957_v38  ;;  %v918_v20 = vsel %vm2953_vm12, %v1833_v40, %v914_v5  ;;  %v964_v17 = vand.u32 2147483647, %v2957_v38 }
  0xb4   : > { %1852 = vpow2.f32 %v1622_v11  ;;  %v1845_v24 = vpop.eup %1844  ;;  %v923_v25 = vsel %vm920_vm13, %v922_v13, %v918_v20  ;;  %v2977_v16 = vadd.f32 1.0, %v1841_v10  ;;  %v966_v29 = vand.u32 2147483648, %v2957_v38 }
  0xb5   : > { %v933_v26 = vsel %vm2962_vm15, %v1835_v55, %v929_v18  ;;  %1450 = vst [vmem:[%s2291_s17 + $0xf0] sm:$0xff] %v923_v25  ;;  %v2981_v36 = vadd.f32 1.0, %v1843_v22  ;;  %v1623_v32 = vmul.f32 -1.442695, %v179_v19  ;;  %vm945_vm0 = vweird.f32 %v2947_v9  ;;  %v181_v55 = vld [vmem:[%s2168_s24 + $0x148] sm:$0xff] }
  0xb6   : > { %v938_v27 = vsel %vm935_vm14, %v937_v15, %v933_v26  ;;  %v1847_v33 = vpop.eup %1846  ;;  %vm960_vm1 = vweird.f32 %v2957_v38  ;;  %1854 = vrcp.f32 %v2977_v16  ;;  %v2987_v35 = vmul.f32 -1.442695, %v180_v1 }
  0xb7   : > { %1451 = vst [vmem:[%s2291_s17 + $0xf8] sm:$0xff] %v938_v27  ;;  %vm2989_vm2 = vcmp.eq.f32.partialorder %v949_v21, 8.507059e+37  ;;  %v952_v41 = vor.u32 1.1754944e-38, %v951_v23  ;;  %v979_v42 = vand.u32 2147483647, %v2977_v16  ;;  %1856 = vrcp.f32 %v2981_v36 }
  0xb8   : > { %v1849_v39 = vpop.eup %1848  ;;  %vm2996_vm4 = vcmp.eq.f32.partialorder %v964_v17, 8.507059e+37  ;;  %v981_v44 = vand.u32 2147483648, %v2977_v16  ;;  %v994_v43 = vand.u32 2147483647, %v2981_v36  ;;  %v967_v47 = vor.u32 1.1754944e-38, %v966_v29 }
  0xb9   : > { %v1851_v53 = vpop.eup %1850  ;;  %v941_v30 = vmul.f32 %v1849_v39, %v2947_v9  ;;  %vm975_vm3 = vweird.f32 %v2977_v16  ;;  %v996_v40 = vand.u32 2147483648, %v2981_v36  ;;  %vm946_vm5 = vweird.f32 %v1849_v39 }
  0xba   : > { %v1853_v45 = vpop.eup %1852  ;;  %v956_v37 = vmul.f32 %v1851_v53, %v2957_v38  ;;  %vm990_vm6 = vweird.f32 %v2981_v36  ;;  %v3006_v49 = vadd.f32 1.0, %v1845_v24  ;;  %vm961_vm7 = vweird.f32 %v1851_v53  ;;  %vm3023_vm10 = vmor %vm945_vm0, %vm946_vm5 }
  0xbb   : > { %v942_v48 = vsub.f32 1.0, %v941_v30  ;;  %vm3008_vm8 = vcmp.eq.f32.partialorder %v979_v42, 8.507059e+37  ;;  %v3012_v34 = vadd.f32 1.0, %v1847_v33  ;;  %1858 = vpow2.f32 %v1623_v32  ;;  %vm3033_vm11 = vmor %vm960_vm1, %vm961_vm7 }
  0xbc   : > { %v957_v50 = vsub.f32 1.0, %v956_v37  ;;  %v1855_v52 = vpop.eup %1854  ;;  %v982_v57 = vor.u32 1.1754944e-38, %v981_v44  ;;  %vm3015_vm9 = vcmp.eq.f32.partialorder %v994_v43, 8.507059e+37  ;;  %1860 = vrcp.f32 %v3006_v49 }
  0xbd   : > { %v943_v56 = vmul.f32 %v1849_v39, %v942_v48  ;;  %v1857_v59 = vpop.eup %1856  ;;  %v971_v61 = vmul.f32 %v1855_v52, %v2977_v16  ;;  %v997_v62 = vor.u32 1.1754944e-38, %v996_v40  ;;  %v3028_v63 = vadd.f32 1.0, %v1853_v45 }
  0xbe   : > { %v958_v46 = vmul.f32 %v1851_v53, %v957_v50  ;;  %v986_v3 = vmul.f32 %v1857_v59, %v2981_v36  ;;  %v1009_v4 = vand.u32 2147483647, %v3006_v49  ;;  %v1625_v6 = vmul.f32 -1.442695, %v181_v55  ;;  %v184_v50 = vld [vmem:[%s2168_s24 + $0x160] sm:$0xff] }
  0xbf   : > { %v944_v0 = vadd.f32 %v1849_v39, %v943_v56  ;;  %v972_v9 = vsub.f32 1.0, %v971_v61  ;;  %vm976_vm12 = vweird.f32 %v1855_v52  ;;  %1862 = vrcp.f32 %v3012_v34 }
  0xc0   : > { %v959_v8 = vadd.f32 %v1851_v53, %v958_v46  ;;  %v987_v12 = vsub.f32 1.0, %v986_v3  ;;  %vm991_vm13 = vweird.f32 %v1857_v59  ;;  %v1011_v13 = vand.u32 2147483648, %v3006_v49  ;;  %vm3053_vm15 = vmor %vm975_vm3, %vm976_vm12 }
  0xc1   : > { %v948_v11 = vsel %vm3023_vm10, %v1849_v39, %v944_v0  ;;  %v1859_v31 = vpop.eup %1858  ;;  %v973_v5 = vmul.f32 %v1855_v52, %v972_v9  ;;  %v1626_v14 = vmul.f32 -1.442695, %v182_v7  ;;  %vm1005_vm14 = vweird.f32 %v3006_v49  ;;  %vm3063_vm0 = vmor %vm990_vm6, %vm991_vm13  ;;  %v186_v0 = vld [vmem:[%s2168_s24 + $0x170] sm:$0xff] }
  0xc2   : > { %v953_v38 = vsel %vm2989_vm2, %v952_v41, %v948_v11  ;;  %v963_v10 = vsel %vm3033_vm11, %v1851_v53, %v959_v8  ;;  %v1861_v15 = vpop.eup %1860  ;;  %v988_v19 = vmul.f32 %v1857_v59, %v987_v12  ;;  %1864 = vrcp.f32 %v3028_v63  ;;  %v187_v53 = vld [vmem:[%s2168_s24 + $0x178] sm:$0xff] }
  0xc3   : > { %1452 = vst [vmem:[%s2291_s17 + $0x100] sm:$0xff] %v953_v38  ;;  %v968_v22 = vsel %vm2996_vm4, %v967_v47, %v963_v10  ;;  %v974_v20 = vadd.f32 %v1855_v52, %v973_v5  ;;  %v1001_v23 = vmul.f32 %v1861_v15, %v3006_v49  ;;  %vm3068_vm1 = vcmp.eq.f32.partialorder %v1009_v4, 8.507059e+37 }
  0xc4   : > { %1453 = vst [vmem:[%s2291_s17 + $0x108] sm:$0xff] %v968_v22  ;;  %v1024_v24 = vand.u32 2147483647, %v3012_v34  ;;  %v989_v25 = vadd.f32 %v1857_v59, %v988_v19  ;;  %vm1006_vm2 = vweird.f32 %v1861_v15  ;;  %v1012_v26 = vor.u32 1.1754944e-38, %v1011_v13 }
  0xc5   : > { %v1026_v17 = vand.u32 2147483648, %v3012_v34  ;;  %v1863_v16 = vpop.eup %1862  ;;  %v978_v27 = vsel %vm3053_vm15, %v1855_v52, %v974_v20  ;;  %v1002_v29 = vsub.f32 1.0, %v1001_v23  ;;  %v3076_v36 = vadd.f32 1.0, %v1859_v31  ;;  %vm3098_vm5 = vmor %vm1005_vm14, %vm1006_vm2 }
  0xc6   : > { %1866 = vpow2.f32 %v2987_v35  ;;  %v983_v32 = vsel %vm3008_vm8, %v982_v57, %v978_v27  ;;  %v993_v33 = vsel %vm3063_vm0, %v1857_v59, %v989_v25  ;;  %v1016_v39 = vmul.f32 %v1863_v16, %v3012_v34  ;;  %v183_v35 = vld [vmem:[%s2168_s24 + $0x158] sm:$0xff] }
  0xc7   : > { %v1039_v28 = vand.u32 2147483647, %v3028_v63  ;;  %1454 = vst [vmem:[%s2291_s17 + $0x110] sm:$0xff] %v983_v32  ;;  %v998_v41 = vsel %vm3015_vm9, %v997_v62, %v993_v33  ;;  %v1003_v42 = vmul.f32 %v1861_v15, %v1002_v29  ;;  %vm1020_vm4 = vweird.f32 %v3012_v34 }
  0xc8   : > { %vm3089_vm3 = vcmp.eq.f32.partialorder %v1024_v24, 8.507059e+37  ;;  %v1865_v30 = vpop.eup %1864  ;;  %1455 = vst [vmem:[%s2291_s17 + $0x118] sm:$0xff] %v998_v41  ;;  %v1017_v44 = vsub.f32 1.0, %v1016_v39  ;;  %vm1021_vm6 = vweird.f32 %v1863_v16  ;;  %v1041_v43 = vand.u32 2147483648, %v3028_v63 }
  0xc9   : > { %1868 = vrcp.f32 %v3076_v36  ;;  %v1004_v45 = vadd.f32 %v1861_v15, %v1003_v42  ;;  %v1027_v37 = vor.u32 1.1754944e-38, %v1026_v17  ;;  %v1031_v47 = vmul.f32 %v1865_v30, %v3028_v63  ;;  %vm3117_vm9 = vmor %vm1020_vm4, %vm1021_vm6 }
  0xca   : > { %vm1035_vm7 = vweird.f32 %v3028_v63  ;;  %v1018_v40 = vmul.f32 %v1863_v16, %v1017_v44  ;;  %vm3106_vm8 = vcmp.eq.f32.partialorder %v1039_v28, 8.507059e+37  ;;  %1870 = vpow2.f32 %v1625_v6 }
  0xcb   : > { %v1627_v49 = vmul.f32 -1.442695, %v183_v35  ;;  %v1008_v52 = vsel %vm3098_vm5, %v1861_v15, %v1004_v45  ;;  %v1032_v57 = vsub.f32 1.0, %v1031_v47  ;;  %vm1036_vm10 = vweird.f32 %v1865_v30 }
  0xcc   : > { %v1867_v55 = vpop.eup %1866  ;;  %1872 = vpow2.f32 %v1626_v14  ;;  %v1013_v58 = vsel %vm3068_vm1, %v1012_v26, %v1008_v52  ;;  %v1019_v59 = vadd.f32 %v1863_v16, %v1018_v40  ;;  %v1042_v60 = vor.u32 1.1754944e-38, %v1041_v43  ;;  %vm3131_vm11 = vmor %vm1035_vm7, %vm1036_vm10 }
  0xcd   : > { %v3123_v46 = vadd.f32 1.0, %v1867_v55  ;;  %1456 = vst [vmem:[%s2291_s17 + $0x120] sm:$0xff] %v1013_v58  ;;  %v1033_v61 = vmul.f32 %v1865_v30, %v1032_v57  ;;  %1874 = vpow2.f32 %v1627_v49  ;;  %v1628_v62 = vmul.f32 -1.442695, %v184_v50 }
  0xce   : > { %v1629_v34 = vmul.f32 -1.442695, %v185_v51  ;;  %v1023_v3 = vsel %vm3117_vm9, %v1863_v16, %v1019_v59  ;;  %vm1050_vm12 = vweird.f32 %v3076_v36  ;;  %v1054_v6 = vand.u32 2147483647, %v3076_v36 }
  0xcf   : > { %v1869_v2 = vpop.eup %1868  ;;  %1876 = vrcp.f32 %v3123_v46  ;;  %v1028_v7 = vsel %vm3089_vm3, %v1027_v37, %v1023_v3  ;;  %v1034_v8 = vadd.f32 %v1865_v30, %v1033_v61  ;;  %v1056_v11 = vand.u32 2147483648, %v3076_v36 }
  0xd0   : > { %v1046_v9 = vmul.f32 %v1869_v2, %v3076_v36  ;;  %v1871_v12 = vpop.eup %1870  ;;  %1457 = vst [vmem:[%s2291_s17 + $0x128] sm:$0xff] %v1028_v7  ;;  %vm1051_vm13 = vweird.f32 %v1869_v2  ;;  %v1069_v63 = vand.u32 2147483647, %v3123_v46  ;;  %1878 = vpow2.f32 %v1628_v62 }
  0xd1   : > { %v1630_v13 = vmul.f32 -1.442695, %v186_v0  ;;  %v1038_v38 = vsel %vm3131_vm11, %v1865_v30, %v1034_v8  ;;  %v3146_v5 = vadd.f32 1.0, %v1871_v12  ;;  %1880 = vpow2.f32 %v1629_v34  ;;  %vm3162_vm14 = vmor %vm1050_vm12, %vm1051_vm13  ;;  %v196_v8 = vld [vmem:[%s2168_s24 + $0x1c0] sm:$0xff] }
  0xd2   : > { %v1873_v31 = vpop.eup %1872  ;;  %v1047_v10 = vsub.f32 1.0, %v1046_v9  ;;  %v1043_v14 = vsel %vm3106_vm8, %v1042_v60, %v1038_v38  ;;  %v1071_v15 = vand.u32 2147483648, %v3123_v46  ;;  %vm3154_vm15 = vcmp.eq.f32.partialorder %v1054_v6, 8.507059e+37 }
  0xd3   : > { %v3151_v22 = vadd.f32 1.0, %v1873_v31  ;;  %1882 = vpow2.f32 %v1630_v13  ;;  %v1875_v18 = vpop.eup %1874  ;;  %1458 = vst [vmem:[%s2291_s17 + $0x130] sm:$0xff] %v1043_v14  ;;  %v1057_v1 = vor.u32 1.1754944e-38, %v1056_v11  ;;  %vm1065_vm0 = vweird.f32 %v3123_v46 }
  0xd4   : > { %v1048_v19 = vmul.f32 %v1869_v2, %v1047_v10  ;;  %1884 = vrcp.f32 %v3146_v5  ;;  %vm3167_vm1 = vcmp.eq.f32.partialorder %v1069_v63, 8.507059e+37  ;;  %v1084_v17 = vand.u32 2147483647, %v3146_v5 }
  0xd5   : > { %v1877_v21 = vpop.eup %1876  ;;  %1886 = vrcp.f32 %v3151_v22  ;;  %v1086_v16 = vand.u32 2147483648, %v3146_v5  ;;  %v1072_v29 = vor.u32 1.1754944e-38, %v1071_v15  ;;  %v1099_v36 = vand.u32 2147483647, %v3151_v22 }
  0xd6   : > { %v1049_v25 = vadd.f32 %v1869_v2, %v1048_v19  ;;  %v1061_v26 = vmul.f32 %v1877_v21, %v3123_v46  ;;  %v1879_v27 = vpop.eup %1878  ;;  %v1101_v32 = vand.u32 2147483648, %v3151_v22  ;;  %v3177_v33 = vadd.f32 1.0, %v1875_v18  ;;  %v188_v18 = vld [vmem:[%s2168_s24 + $0x180] sm:$0xff] }
  0xd7   : > { %v1881_v39 = vpop.eup %1880  ;;  %vm1066_vm2 = vweird.f32 %v1877_v21  ;;  %v3181_v42 = vadd.f32 1.0, %v1879_v27  ;;  %vm1080_vm4 = vweird.f32 %v3146_v5  ;;  %vm1095_vm3 = vweird.f32 %v3151_v22 }
  0xd8   : > { %v1053_v28 = vsel %vm3162_vm14, %v1869_v2, %v1049_v25  ;;  %v1062_v41 = vsub.f32 1.0, %v1061_v26  ;;  %1888 = vrcp.f32 %v3177_v33  ;;  %vm3190_vm5 = vcmp.eq.f32.partialorder %v1084_v17, 8.507059e+37  ;;  %vm3198_vm6 = vmor %vm1065_vm0, %vm1066_vm2  ;;  %v195_v2 = vld [vmem:[%s2168_s24 + $0x1b8] sm:$0xff] }
  0xd9   : > { %v1883_v35 = vpop.eup %1882  ;;  %v1058_v30 = vsel %vm3154_vm15, %v1057_v1, %v1053_v28  ;;  %v1087_v45 = vor.u32 1.1754944e-38, %v1086_v16  ;;  %1890 = vrcp.f32 %v3181_v42  ;;  %vm3203_vm7 = vcmp.eq.f32.partialorder %v1099_v36, 8.507059e+37 }
  0xda   : > { %v1885_v54 = vpop.eup %1884  ;;  %1459 = vst [vmem:[%s2291_s17 + $0x138] sm:$0xff] %v1058_v30  ;;  %v1063_v44 = vmul.f32 %v1877_v21, %v1062_v41  ;;  %v1102_v49 = vor.u32 1.1754944e-38, %v1101_v32  ;;  %v1631_v50 = vmul.f32 -1.442695, %v187_v53  ;;  %vm1110_vm8 = vweird.f32 %v3177_v33  ;;  %v189_v41 = vld [vmem:[%s2168_s24 + $0x188] sm:$0xff] }
  0xdb   : > { %v1887_v37 = vpop.eup %1886  ;;  %v1076_v40 = vmul.f32 %v1885_v54, %v3146_v5  ;;  %v1114_v52 = vand.u32 2147483647, %v3177_v33  ;;  %vm1081_vm9 = vweird.f32 %v1885_v54  ;;  %v1116_v57 = vand.u32 2147483648, %v3177_v33 }
  0xdc   : > { %v1064_v51 = vadd.f32 %v1877_v21, %v1063_v44  ;;  %v1091_v55 = vmul.f32 %v1887_v37, %v3151_v22  ;;  %vm1125_vm10 = vweird.f32 %v3181_v42  ;;  %vm1096_vm11 = vweird.f32 %v1887_v37  ;;  %vm3223_vm12 = vmor %vm1080_vm4, %vm1081_vm9  ;;  %v191_v44 = vld [vmem:[%s2168_s24 + $0x198] sm:$0xff] }
  0xdd   : > { %v1077_v56 = vsub.f32 1.0, %v1076_v40  ;;  %v3214_v60 = vadd.f32 1.0, %v1881_v39  ;;  %v3218_v34 = vadd.f32 1.0, %v1883_v35  ;;  %1892 = vpow2.f32 %v1631_v50  ;;  %vm3233_vm13 = vmor %vm1095_vm3, %vm1096_vm11  ;;  %v192_v40 = vld [vmem:[%s2168_s24 + $0x1a0] sm:$0xff] }
  0xde   : > { %v1068_v58 = vsel %vm3198_vm6, %v1877_v21, %v1064_v51  ;;  %v1092_v59 = vsub.f32 1.0, %v1091_v55  ;;  %v1889_v46 = vpop.eup %1888  ;;  %v1129_v6 = vand.u32 2147483647, %v3181_v42  ;;  %vm3237_vm15 = vcmp.eq.f32.partialorder %v1114_v52, 8.507059e+37  ;;  %v193_v51 = vld [vmem:[%s2168_s24 + $0x1a8] sm:$0xff] }
  0xdf   : > { %v1073_v61 = vsel %vm3167_vm1, %v1072_v29, %v1068_v58  ;;  %v1078_v62 = vmul.f32 %v1885_v54, %v1077_v56  ;;  %v1891_v0 = vpop.eup %1890  ;;  %v1106_v4 = vmul.f32 %v1889_v46, %v3177_v33  ;;  %1894 = vrcp.f32 %v3214_v60  ;;  %v194_v58 = vld [vmem:[%s2168_s24 + $0x1b0] sm:$0xff] }
  0xe0   : > { %1460 = vst [vmem:[%s2291_s17 + $0x140] sm:$0xff] %v1073_v61  ;;  %v1093_v3 = vmul.f32 %v1887_v37, %v1092_v59  ;;  %v1121_v11 = vmul.f32 %v1891_v0, %v3181_v42  ;;  %v1131_v12 = vand.u32 2147483648, %v3181_v42  ;;  %vm1111_vm14 = vweird.f32 %v1889_v46 }
  0xe1   : > { %v1079_v7 = vadd.f32 %v1885_v54, %v1078_v62  ;;  %v1107_v13 = vsub.f32 1.0, %v1106_v4  ;;  %v1117_v31 = vor.u32 1.1754944e-38, %v1116_v57  ;;  %vm1126_vm0 = vweird.f32 %v1891_v0  ;;  %vm3260_vm2 = vmor %vm1110_vm8, %vm1111_vm14 }
  0xe2   : > { %v1094_v63 = vadd.f32 %v1887_v37, %v1093_v3  ;;  %v1122_v10 = vsub.f32 1.0, %v1121_v11  ;;  %1896 = vrcp.f32 %v3218_v34  ;;  %vm3250_vm1 = vcmp.eq.f32.partialorder %v1129_v6, 8.507059e+37  ;;  %vm3269_vm3 = vmor %vm1125_vm10, %vm1126_vm0 }
  0xe3   : > { %v1083_v38 = vsel %vm3223_vm12, %v1885_v54, %v1079_v7  ;;  %v1108_v15 = vmul.f32 %v1889_v46, %v1107_v13  ;;  %v1893_v19 = vpop.eup %1892  ;;  %v1132_v1 = vor.u32 1.1754944e-38, %v1131_v12  ;;  %vm1140_vm4 = vweird.f32 %v3214_v60  ;;  %v190_v54 = vld [vmem:[%s2168_s24 + $0x190] sm:$0xff] }
  0xe4   : > { %v1088_v5 = vsel %vm3190_vm5, %v1087_v45, %v1083_v38  ;;  %v1098_v14 = vsel %vm3233_vm13, %v1887_v37, %v1094_v63  ;;  %v1123_v23 = vmul.f32 %v1891_v0, %v1122_v10  ;;  %v1144_v17 = vand.u32 2147483647, %v3214_v60  ;;  %v197_v38 = vld [vmem:[%s2168_s24 + $0x1c8] sm:$0xff] }
  0xe5   : > { %1461 = vst [vmem:[%s2291_s17 + $0x148] sm:$0xff] %v1088_v5  ;;  %v1103_v20 = vsel %vm3203_vm7, %v1102_v49, %v1098_v14  ;;  %v1895_v24 = vpop.eup %1894  ;;  %v1109_v25 = vadd.f32 %v1889_v46, %v1108_v15  ;;  %v1146_v16 = vand.u32 2147483648, %v3214_v60  ;;  %v3275_v27 = vadd.f32 1.0, %v1893_v19 }
  0xe6   : > { %1462 = vst [vmem:[%s2291_s17 + $0x150] sm:$0xff] %v1103_v20  ;;  %v1124_v29 = vadd.f32 %v1891_v0, %v1123_v23  ;;  %v1136_v36 = vmul.f32 %v1895_v24, %v3214_v60  ;;  %v1159_v32 = vand.u32 2147483647, %v3218_v34  ;;  %v1632_v33 = vmul.f32 -1.442695, %v188_v18  ;;  %v203_v20 = vld [vmem:[%s2168_s24 + $0x1f8] sm:$0xff] }
  0xe7   : > { %v1113_v39 = vsel %vm3260_vm2, %v1889_v46, %v1109_v25  ;;  %vm1155_vm5 = vweird.f32 %v3218_v34  ;;  %v1161_v28 = vand.u32 2147483648, %v3218_v34  ;;  %1898 = vrcp.f32 %v3275_v27 }
  0xe8   : > { %v1897_v42 = vpop.eup %1896  ;;  %v1118_v53 = vsel %vm3237_vm15, %v1117_v31, %v1113_v39  ;;  %v1128_v35 = vsel %vm3269_vm3, %v1891_v0, %v1124_v29  ;;  %v1137_v30 = vsub.f32 1.0, %v1136_v36  ;;  %vm1141_vm6 = vweird.f32 %v1895_v24  ;;  %v198_v36 = vld [vmem:[%s2168_s24 + $0x1d0] sm:$0xff] }
  0xe9   : > { %1463 = vst [vmem:[%s2291_s17 + $0x158] sm:$0xff] %v1118_v53  ;;  %v1133_v43 = vsel %vm3250_vm1, %v1132_v1, %v1128_v35  ;;  %vm3294_vm7 = vcmp.eq.f32.partialorder %v1144_v17, 8.507059e+37  ;;  %v1147_v37 = vor.u32 1.1754944e-38, %v1146_v16  ;;  %v1151_v47 = vmul.f32 %v1897_v42, %v3218_v34  ;;  %vm3309_vm9 = vmor %vm1140_vm4, %vm1141_vm6 }
  0xea   : > { %1464 = vst [vmem:[%s2291_s17 + $0x160] sm:$0xff] %v1133_v43  ;;  %v1138_v48 = vmul.f32 %v1895_v24, %v1137_v30  ;;  %vm3301_vm8 = vcmp.eq.f32.partialorder %v1159_v32, 8.507059e+37  ;;  %1900 = vpow2.f32 %v1632_v33  ;;  %v1633_v50 = vmul.f32 -1.442695, %v189_v41  ;;  %v199_v32 = vld [vmem:[%s2168_s24 + $0x1d8] sm:$0xff] }
  0xeb   : > { %v1152_v52 = vsub.f32 1.0, %v1151_v47  ;;  %vm1156_vm10 = vweird.f32 %v1897_v42  ;;  %v1634_v56 = vmul.f32 -1.442695, %v190_v54  ;;  %v1635_v57 = vmul.f32 -1.442695, %v191_v44 }
  0xec   : > { %v1139_v59 = vadd.f32 %v1895_v24, %v1138_v48  ;;  %v1162_v46 = vor.u32 1.1754944e-38, %v1161_v28  ;;  %1902 = vpow2.f32 %v1633_v50  ;;  %v1636_v61 = vmul.f32 -1.442695, %v192_v40  ;;  %vm3321_vm12 = vmor %vm1155_vm5, %vm1156_vm10 }
  0xed   : > { %v1899_v62 = vpop.eup %1898  ;;  %v1153_v0 = vmul.f32 %v1897_v42, %v1152_v52  ;;  %vm1170_vm11 = vweird.f32 %v3275_v27  ;;  %1904 = vpow2.f32 %v1634_v56  ;;  %v1637_v60 = vmul.f32 -1.442695, %v193_v51 }
  0xee   : > { %v1143_v3 = vsel %vm3309_vm9, %v1895_v24, %v1139_v59  ;;  %v1166_v6 = vmul.f32 %v1899_v62, %v3275_v27  ;;  %1906 = vpow2.f32 %v1635_v57  ;;  %v1638_v7 = vmul.f32 -1.442695, %v194_v58 }
  0xef   : > { %v1148_v9 = vsel %vm3294_vm7, %v1147_v37, %v1143_v3  ;;  %v1154_v11 = vadd.f32 %v1897_v42, %v1153_v0  ;;  %v1174_v12 = vand.u32 2147483647, %v3275_v27  ;;  %v1176_v63 = vand.u32 2147483648, %v3275_v27 }
  0xf0   : > { %v1901_v13 = vpop.eup %1900  ;;  %1465 = vst [vmem:[%s2291_s17 + $0x168] sm:$0xff] %v1148_v9  ;;  %v1167_v34 = vsub.f32 1.0, %v1166_v6  ;;  %vm1171_vm13 = vweird.f32 %v1899_v62  ;;  %1908 = vpow2.f32 %v1636_v61  ;;  %v1639_v31 = vmul.f32 -1.442695, %v195_v2 }
  0xf1   : > { %v1158_v10 = vsel %vm3321_vm12, %v1897_v42, %v1154_v11  ;;  %v3335_v5 = vadd.f32 1.0, %v1901_v13  ;;  %1910 = vpow2.f32 %v1637_v60  ;;  %v1640_v14 = vmul.f32 -1.442695, %v196_v8  ;;  %vm3342_vm15 = vmor %vm1170_vm11, %vm1171_vm13 }
  0xf2   : > { %v1903_v15 = vpop.eup %1902  ;;  %v1163_v22 = vsel %vm3301_vm8, %v1162_v46, %v1158_v10  ;;  %v1168_v18 = vmul.f32 %v1899_v62, %v1167_v34  ;;  %1912 = vpow2.f32 %v1638_v7  ;;  %vm3346_vm14 = vcmp.eq.f32.partialorder %v1174_v12, 8.507059e+37 }
  0xf3   : > { %v1905_v19 = vpop.eup %1904  ;;  %1466 = vst [vmem:[%s2291_s17 + $0x170] sm:$0xff] %v1163_v22  ;;  %v1177_v23 = vor.u32 1.1754944e-38, %v1176_v63  ;;  %1914 = vrcp.f32 %v3335_v5  ;;  %v1641_v1 = vmul.f32 -1.442695, %v197_v38  ;;  %v3351_v26 = vadd.f32 1.0, %v1903_v15 }
  0xf4   : > { %v1907_v24 = vpop.eup %1906  ;;  %v1169_v25 = vadd.f32 %v1899_v62, %v1168_v18  ;;  %v3353_v17 = vadd.f32 1.0, %v1905_v19  ;;  %1916 = vpow2.f32 %v1639_v31  ;;  %v1189_v16 = vand.u32 2147483647, %v3335_v5 }
  0xf5   : > { %v1191_v27 = vand.u32 2147483648, %v3335_v5  ;;  %v3357_v29 = vadd.f32 1.0, %v1907_v24  ;;  %1918 = vpow2.f32 %v1640_v14  ;;  %v1204_v42 = vand.u32 2147483647, %v3351_v26 }
  0xf6   : > { %v1909_v33 = vpop.eup %1908  ;;  %v1173_v39 = vsel %vm3342_vm15, %v1899_v62, %v1169_v25  ;;  %1920 = vrcp.f32 %v3351_v26  ;;  %v1206_v53 = vand.u32 2147483648, %v3351_v26  ;;  %vm1185_vm0 = vweird.f32 %v3335_v5 }
  0xf7   : > { %v1911_v28 = vpop.eup %1910  ;;  %v1178_v41 = vsel %vm3346_vm14, %v1177_v23, %v1173_v39  ;;  %1922 = vrcp.f32 %v3353_v17  ;;  %v3372_v30 = vmul.f32 -1.442695, %v198_v36  ;;  %v3374_v54 = vmul.f32 -1.442695, %v199_v32 }
  0xf8   : > { %v1913_v35 = vpop.eup %1912  ;;  %1467 = vst [vmem:[%s2291_s17 + $0x178] sm:$0xff] %v1178_v41  ;;  %1924 = vrcp.f32 %v3357_v29  ;;  %vm3376_vm1 = vcmp.eq.f32.partialorder %v1189_v16, 8.507059e+37  ;;  %v1192_v45 = vor.u32 1.1754944e-38, %v1191_v27  ;;  %v1219_v37 = vand.u32 2147483647, %v3353_v17 }
  0xf9   : > { %v1915_v44 = vpop.eup %1914  ;;  %1926 = vpow2.f32 %v1641_v1  ;;  %vm1200_vm2 = vweird.f32 %v3351_v26  ;;  %v1221_v48 = vand.u32 2147483648, %v3353_v17  ;;  %v1234_v49 = vand.u32 2147483647, %v3357_v29 }
  0xfa   : > { %v1917_v47 = vpop.eup %1916  ;;  %v1181_v40 = vmul.f32 %v1915_v44, %v3335_v5  ;;  %vm3385_vm4 = vcmp.eq.f32.partialorder %v1204_v42, 8.507059e+37  ;;  %v1207_v55 = vor.u32 1.1754944e-38, %v1206_v53  ;;  %vm1215_vm3 = vweird.f32 %v3353_v17  ;;  %v200_v53 = vld [vmem:[%s2168_s24 + $0x1e0] sm:$0xff] }
  0xfb   : > { %v1919_v50 = vpop.eup %1918  ;;  %v3390_v52 = vadd.f32 1.0, %v1909_v33  ;;  %vm1186_vm5 = vweird.f32 %v1915_v44  ;;  %vm1230_vm6 = vweird.f32 %v3357_v29  ;;  %v3393_v58 = vadd.f32 1.0, %v1911_v28 }
  0xfc   : > { %v1921_v56 = vpop.eup %1920  ;;  %v1182_v57 = vsub.f32 1.0, %v1181_v40  ;;  %vm3396_vm7 = vcmp.eq.f32.partialorder %v1219_v37, 8.507059e+37  ;;  %v1236_v62 = vand.u32 2147483648, %v3357_v29  ;;  %v1222_v3 = vor.u32 1.1754944e-38, %v1221_v48  ;;  %vm3411_vm9 = vmor %vm1185_vm0, %vm1186_vm5 }
  0xfd   : > { %v1923_v59 = vpop.eup %1922  ;;  %v1196_v46 = vmul.f32 %v1921_v56, %v3351_v26  ;;  %1928 = vrcp.f32 %v3390_v52  ;;  %vm3403_vm8 = vcmp.eq.f32.partialorder %v1234_v49, 8.507059e+37  ;;  %vm1201_vm10 = vweird.f32 %v1921_v56 }
  0xfe   : > { %v1925_v0 = vpop.eup %1924  ;;  %v1183_v60 = vmul.f32 %v1915_v44, %v1182_v57  ;;  %v1211_v2 = vmul.f32 %v1923_v59, %v3353_v17  ;;  %v3416_v11 = vadd.f32 1.0, %v1913_v35  ;;  %vm1216_vm11 = vweird.f32 %v1923_v59  ;;  %vm3424_vm13 = vmor %vm1200_vm2, %vm1201_vm10 }
  0xff   : > { %v3407_v6 = vpop.eup %1926  ;;  %v1197_v8 = vsub.f32 1.0, %v1196_v46  ;;  %v1226_v9 = vmul.f32 %v1925_v0, %v3357_v29  ;;  %1930 = vrcp.f32 %v3393_v58  ;;  %vm1231_vm12 = vweird.f32 %v1925_v0  ;;  %vm3434_vm15 = vmor %vm1215_vm3, %vm1216_vm11 }
 0x100   : > { %v1184_v12 = vadd.f32 %v1915_v44, %v1183_v60  ;;  %v1212_v63 = vsub.f32 1.0, %v1211_v2  ;;  %v1251_v31 = vand.u32 2147483648, %v3390_v52  ;;  %v1237_v14 = vor.u32 1.1754944e-38, %v1236_v62  ;;  %vm3443_vm14 = vmor %vm1230_vm6, %vm1231_vm12 }
 0x101   : > { %v1198_v13 = vmul.f32 %v1921_v56, %v1197_v8  ;;  %v1227_v34 = vsub.f32 1.0, %v1226_v9  ;;  %v3428_v15 = vadd.f32 1.0, %v1917_v47  ;;  %1932 = vrcp.f32 %v3416_v11 }
 0x102   : > { %v1188_v38 = vsel %vm3411_vm9, %v1915_v44, %v1184_v12  ;;  %v1213_v5 = vmul.f32 %v1923_v59, %v1212_v63  ;;  %vm1245_vm0 = vweird.f32 %v3390_v52  ;;  %v3449_v25 = vadd.f32 1.0, %v1919_v50 }
 0x103   : > { %v1929_v22 = vpop.eup %1928  ;;  %v1193_v18 = vsel %vm3376_vm1, %v1192_v45, %v1188_v38  ;;  %v1199_v19 = vadd.f32 %v1921_v56, %v1198_v13  ;;  %v1228_v21 = vmul.f32 %v1925_v0, %v1227_v34  ;;  %v1249_v16 = vand.u32 2147483647, %v3390_v52  ;;  %v202_v34 = vld [vmem:[%s2168_s24 + $0x1f0] sm:$0xff] }
 0x104   : > { %1468 = vst [vmem:[%s2291_s17 + $0x180] sm:$0xff] %v1193_v18  ;;  %v1214_v23 = vadd.f32 %v1923_v59, %v1213_v5  ;;  %v1241_v24 = vmul.f32 %v1929_v22, %v3390_v52  ;;  %v1252_v27 = vor.u32 1.1754944e-38, %v1251_v31  ;;  %vm1246_vm1 = vweird.f32 %v1929_v22 }
 0x105   : > { %v1203_v26 = vsel %vm3424_vm13, %v1921_v56, %v1199_v19  ;;  %v1229_v17 = vadd.f32 %v1925_v0, %v1228_v21  ;;  %v1931_v29 = vpop.eup %1930  ;;  %v1266_v42 = vand.u32 2147483648, %v3393_v58  ;;  %vm1260_vm2 = vweird.f32 %v3393_v58 }
 0x106   : > { %v1208_v36 = vsel %vm3385_vm4, %v1207_v55, %v1203_v26  ;;  %v1218_v32 = vsel %vm3434_vm15, %v1923_v59, %v1214_v23  ;;  %v1242_v33 = vsub.f32 1.0, %v1241_v24  ;;  %v1256_v41 = vmul.f32 %v1931_v29, %v3393_v58  ;;  %vm3474_vm4 = vmor %vm1245_vm0, %vm1246_vm1 }
 0x107   : > { %1469 = vst [vmem:[%s2291_s17 + $0x188] sm:$0xff] %v1208_v36  ;;  %v1223_v39 = vsel %vm3396_vm7, %v1222_v3, %v1218_v32  ;;  %v1233_v28 = vsel %vm3443_vm14, %v1925_v0, %v1229_v17  ;;  %v1264_v43 = vand.u32 2147483647, %v3393_v58  ;;  %v1933_v45 = vpop.eup %1932  ;;  %vm1261_vm3 = vweird.f32 %v1931_v29  ;;  %v201_v0 = vld [vmem:[%s2168_s24 + $0x1e8] sm:$0xff] }
 0x108   : > { %1470 = vst [vmem:[%s2291_s17 + $0x190] sm:$0xff] %v1223_v39  ;;  %v1238_v35 = vsel %vm3403_vm8, %v1237_v14, %v1233_v28  ;;  %v1243_v44 = vmul.f32 %v1929_v22, %v1242_v33  ;;  %v1257_v47 = vsub.f32 1.0, %v1256_v41  ;;  %v1279_v40 = vand.u32 2147483647, %v3416_v11  ;;  %vm3487_vm6 = vmor %vm1260_vm2, %vm1261_vm3 }
 0x109   : > { %1471 = vst [vmem:[%s2291_s17 + $0x198] sm:$0xff] %v1238_v35  ;;  %1934 = vrcp.f32 %v3428_v15  ;;  %vm1250_vm5 = vcmp.eq.f32.partialorder %v1249_v16, 8.507059e+37  ;;  %v1271_v49 = vmul.f32 %v1933_v45, %v3416_v11  ;;  %v1644_v50 = vmul.f32 -1.442695, %v200_v53 }
 0x10a   : > { %v1244_v48 = vadd.f32 %v1929_v22, %v1243_v44  ;;  %v1258_v51 = vmul.f32 %v1931_v29, %v1257_v47  ;;  %v1267_v55 = vor.u32 1.1754944e-38, %v1266_v42  ;;  %v1281_v52 = vand.u32 2147483648, %v3416_v11 }
 0x10b   : > { %1936 = vrcp.f32 %v3449_v25  ;;  %v1272_v59 = vsub.f32 1.0, %v1271_v49  ;;  %vm1275_vm7 = vweird.f32 %v3416_v11  ;;  %vm1276_vm8 = vweird.f32 %v1933_v45 }
 0x10c   : > { %v1248_v56 = vsel %vm3474_vm4, %v1929_v22, %v1244_v48  ;;  %v1259_v61 = vadd.f32 %v1931_v29, %v1258_v51  ;;  %vm1265_vm9 = vcmp.eq.f32.partialorder %v1264_v43, 8.507059e+37  ;;  %vm3492_vm10 = vcmp.eq.f32.partialorder %v1279_v40, 8.507059e+37  ;;  %vm3505_vm12 = vmor %vm1275_vm7, %vm1276_vm8 }
 0x10d   : > { %v1253_v46 = vsel %vm1250_vm5, %v1252_v27, %v1248_v56  ;;  %v1273_v60 = vmul.f32 %v1933_v45, %v1272_v59  ;;  %vm1290_vm11 = vweird.f32 %v3428_v15  ;;  %v3500_v58 = vadd.f32 1.0, %v3407_v6 }
 0x10e   : > { %1472 = vst [vmem:[%s2291_s17 + $0x1a0] sm:$0xff] %v1253_v46  ;;  %1938 = vpow2.f32 %v3372_v30  ;;  %v1263_v3 = vsel %vm3487_vm6, %v1931_v29, %v1259_v61  ;;  %v1282_v7 = vor.u32 1.1754944e-38, %v1281_v52  ;;  %v1294_v8 = vand.u32 2147483647, %v3428_v15 }
 0x10f   : > { %v1935_v2 = vpop.eup %1934  ;;  %1940 = vpow2.f32 %v3374_v54  ;;  %v1268_v9 = vsel %vm1265_vm9, %v1267_v55, %v1263_v3  ;;  %v1274_v11 = vadd.f32 %v1933_v45, %v1273_v60  ;;  %v1645_v12 = vmul.f32 -1.442695, %v201_v0 }
 0x110   : > { %v1286_v6 = vmul.f32 %v1935_v2, %v3428_v15  ;;  %1473 = vst [vmem:[%s2291_s17 + $0x1a8] sm:$0xff] %v1268_v9  ;;  %v1296_v63 = vand.u32 2147483648, %v3428_v15  ;;  %vm1305_vm13 = vweird.f32 %v3449_v25  ;;  %v1309_v13 = vand.u32 2147483647, %v3449_v25 }
 0x111   : > { %v1937_v30 = vpop.eup %1936  ;;  %1942 = vrcp.f32 %v3500_v58  ;;  %v1278_v54 = vsel %vm3505_vm12, %v1933_v45, %v1274_v11  ;;  %vm1291_vm15 = vweird.f32 %v1935_v2  ;;  %v1311_v5 = vand.u32 2147483648, %v3449_v25 }
 0x112   : > { %v1287_v31 = vsub.f32 1.0, %v1286_v6  ;;  %v1301_v38 = vmul.f32 %v1937_v30, %v3449_v25  ;;  %v1283_v10 = vsel %vm3492_vm10, %v1282_v7, %v1278_v54  ;;  %vm1306_vm14 = vweird.f32 %v1937_v30  ;;  %vm3528_vm0 = vmor %vm1290_vm11, %vm1291_vm15 }
 0x113   : > { %1944 = vpow2.f32 %v1644_v50  ;;  %1474 = vst [vmem:[%s2291_s17 + $0x1b0] sm:$0xff] %v1283_v10  ;;  %v1646_v19 = vmul.f32 -1.442695, %v202_v34  ;;  %v1297_v1 = vor.u32 1.1754944e-38, %v1296_v63  ;;  %vm1295_vm1 = vcmp.eq.f32.partialorder %v1294_v8, 8.507059e+37  ;;  %vm3537_vm2 = vmor %vm1305_vm13, %vm1306_vm14 }
 0x114   : > { %v1939_v14 = vpop.eup %1938  ;;  %v1288_v22 = vmul.f32 %v1935_v2, %v1287_v31  ;;  %v1302_v18 = vsub.f32 1.0, %v1301_v38  ;;  %1946 = vpow2.f32 %v1645_v12  ;;  %vm3541_vm4 = vcmp.eq.f32.partialorder %v1309_v13, 8.507059e+37 }
 0x115   : > { %v1941_v21 = vpop.eup %1940  ;;  %v454_v24 = vadd.f32 1.0, %v1939_v14  ;;  %v1312_v36 = vor.u32 1.1754944e-38, %v1311_v5  ;;  %v1647_v32 = vmul.f32 -1.442695, %v203_v20  ;;  %vm1320_vm3 = vweird.f32 %v3500_v58 }
 0x116   : > { %v1289_v26 = vadd.f32 %v1935_v2, %v1288_v22  ;;  %v1303_v17 = vmul.f32 %v1937_v30, %v1302_v18  ;;  %v3532_v16 = vadd.f32 1.0, %v1941_v21  ;;  %v1326_v42 = vand.u32 2147483648, %v3500_v58 }
 0x117   : > { %v1943_v27 = vpop.eup %1942  ;;  %1948 = vrcp.f32 %v454_v24  ;;  %v1324_v43 = vand.u32 2147483647, %v3500_v58  ;;  %v1339_v51 = vand.u32 2147483647, %v454_v24  ;;  %v1341_v55 = vand.u32 2147483648, %v454_v24 }
 0x118   : > { %v1293_v33 = vsel %vm3528_vm0, %v1935_v2, %v1289_v26  ;;  %v1304_v39 = vadd.f32 %v1937_v30, %v1303_v17  ;;  %v1316_v28 = vmul.f32 %v1943_v27, %v3500_v58  ;;  %1950 = vpow2.f32 %v1646_v19 }
 0x119   : > { %v1945_v25 = vpop.eup %1944  ;;  %v1298_v41 = vsel %vm1295_vm1, %v1297_v1, %v1293_v33  ;;  %1952 = vrcp.f32 %v3532_v16  ;;  %vm1321_vm5 = vweird.f32 %v1943_v27  ;;  %v1327_v50 = vor.u32 1.1754944e-38, %v1326_v42 }
 0x11a   : > { %v1947_v53 = vpop.eup %1946  ;;  %1475 = vst [vmem:[%s2291_s17 + $0x1b8] sm:$0xff] %v1298_v41  ;;  %v1308_v35 = vsel %vm3537_vm2, %v1937_v30, %v1304_v39  ;;  %v1317_v44 = vsub.f32 1.0, %v1316_v28  ;;  %v3557_v37 = vadd.f32 1.0, %v1945_v25  ;;  %1954 = vpow2.f32 %v1647_v32  ;;  %vm3564_vm6 = vmor %vm1320_vm3, %vm1321_vm5 }
 0x11b   : > { %v1313_v45 = vsel %vm3541_vm4, %v1312_v36, %v1308_v35  ;;  %v3559_v47 = vadd.f32 1.0, %v1947_v53  ;;  %vm1325_vm7 = vcmp.eq.f32.partialorder %v1324_v43, 8.507059e+37  ;;  %vm1335_vm8 = vweird.f32 %v454_v24 }
 0x11c   : > { %1476 = vst [vmem:[%s2291_s17 + $0x1c0] sm:$0xff] %v1313_v45  ;;  %v1318_v40 = vmul.f32 %v1943_v27, %v1317_v44  ;;  %1956 = vrcp.f32 %v3557_v37  ;;  %v1354_v46 = vand.u32 2147483647, %v3532_v16  ;;  %v1356_v61 = vand.u32 2147483648, %v3532_v16 }
 0x11d   : > { %v1949_v48 = vpop.eup %1948  ;;  %1958 = vrcp.f32 %v3559_v47  ;;  %vm3575_vm10 = vcmp.eq.f32.partialorder %v1339_v51, 8.507059e+37  ;;  %v1342_v3 = vor.u32 1.1754944e-38, %v1341_v55  ;;  %vm1350_vm11 = vweird.f32 %v3532_v16 }
 0x11e   : > { %v1951_v52 = vpop.eup %1950  ;;  %v1319_v56 = vadd.f32 %v1943_v27, %v1318_v40  ;;  %v1331_v57 = vmul.f32 %v1949_v48, %v454_v24  ;;  %vm1336_vm9 = vweird.f32 %v1949_v48  ;;  %vm3588_vm15 = vcmp.eq.f32.partialorder %v1354_v46, 8.507059e+37 }
 0x11f   : > { %v1953_v59 = vpop.eup %1952  ;;  %v3581_v9 = vadd.f32 1.0, %v1951_v52  ;;  %vm3584_vm13 = vmor %vm1335_vm8, %vm1336_vm9  ;;  %v1357_v30 = vor.u32 1.1754944e-38, %v1356_v61  ;;  %vm1365_vm14 = vweird.f32 %v3557_v37  ;;  %v1369_v63 = vand.u32 2147483647, %v3557_v37 }
 0x120   : > { %v1323_v62 = vsel %vm3564_vm6, %v1943_v27, %v1319_v56  ;;  %v1332_v0 = vsub.f32 1.0, %v1331_v57  ;;  %v1346_v60 = vmul.f32 %v1953_v59, %v3532_v16  ;;  %v1955_v4 = vpop.eup %1954  ;;  %vm1351_vm12 = vweird.f32 %v1953_v59 }
 0x121   : > { %v1328_v58 = vsel %vm1325_vm7, %v1327_v50, %v1323_v62  ;;  %v3595_v31 = vadd.f32 1.0, %v1955_v4  ;;  %vm3599_vm0 = vmor %vm1350_vm11, %vm1351_vm12  ;;  %v1371_v5 = vand.u32 2147483648, %v3557_v37  ;;  %vm1380_vm2 = vweird.f32 %v3559_v47 }
 0x122   : > { %1477 = vst [vmem:[%s2291_s17 + $0x1c8] sm:$0xff] %v1328_v58  ;;  %v1333_v7 = vmul.f32 %v1949_v48, %v1332_v0  ;;  %v1347_v8 = vsub.f32 1.0, %v1346_v60  ;;  %v1957_v11 = vpop.eup %1956  ;;  %1960 = vrcp.f32 %v3581_v9  ;;  %v1384_v21 = vand.u32 2147483647, %v3559_v47 }
 0x123   : > { %v1361_v54 = vmul.f32 %v1957_v11, %v3557_v37  ;;  %v1959_v38 = vpop.eup %1958  ;;  %vm1366_vm1 = vweird.f32 %v1957_v11  ;;  %v1386_v23 = vand.u32 2147483648, %v3559_v47  ;;  %1962 = vrcp.f32 %v3595_v31 }
 0x124   : > { %v1334_v13 = vadd.f32 %v1949_v48, %v1333_v7  ;;  %v1348_v34 = vmul.f32 %v1953_v59, %v1347_v8  ;;  %v1376_v19 = vmul.f32 %v1959_v38, %v3559_v47  ;;  %vm1381_vm4 = vweird.f32 %v1959_v38  ;;  %vm1367_vm3 = vmor %vm1365_vm14, %vm1366_vm1 }
 0x125   : > { %v1362_v18 = vsub.f32 1.0, %v1361_v54  ;;  %v1372_v16 = vor.u32 1.1754944e-38, %v1371_v5  ;;  %vm1370_vm5 = vcmp.eq.f32.partialorder %v1369_v63, 8.507059e+37  ;;  %vm3626_vm6 = vmor %vm1380_vm2, %vm1381_vm4  ;;  %vm1385_vm7 = vcmp.eq.f32.partialorder %v1384_v21, 8.507059e+37 }
 0x126   : > { %v1338_v14 = vsel %vm3584_vm13, %v1949_v48, %v1334_v13  ;;  %v1349_v22 = vadd.f32 %v1953_v59, %v1348_v34  ;;  %v1377_v26 = vsub.f32 1.0, %v1376_v19  ;;  %v1387_v32 = vor.u32 1.1754944e-38, %v1386_v23 }
 0x127   : > { %v1343_v20 = vsel %vm3575_vm10, %v1342_v3, %v1338_v14  ;;  %v1363_v24 = vmul.f32 %v1957_v11, %v1362_v18  ;;  %v1401_v25 = vand.u32 2147483648, %v3581_v9  ;;  %vm1395_vm8 = vweird.f32 %v3581_v9 }
 0x128   : > { %1478 = vst [vmem:[%s2291_s17 + $0x1d0] sm:$0xff] %v1343_v20  ;;  %v1353_v1 = vsel %vm3599_vm0, %v1953_v59, %v1349_v22  ;;  %v1378_v29 = vmul.f32 %v1959_v38, %v1377_v26  ;;  %v1961_v15 = vpop.eup %1960  ;;  %v1399_v44 = vand.u32 2147483647, %v3581_v9  ;;  %v1416_v40 = vand.u32 2147483648, %v3595_v31 }
 0x129   : > { %v1358_v17 = vsel %vm3588_vm15, %v1357_v30, %v1353_v1  ;;  %v1364_v27 = vadd.f32 %v1957_v11, %v1363_v24  ;;  %v1391_v28 = vmul.f32 %v1961_v15, %v3581_v9  ;;  %v1963_v42 = vpop.eup %1962  ;;  %vm1396_vm9 = vweird.f32 %v1961_v15 }
 0x12a   : > { %1479 = vst [vmem:[%s2291_s17 + $0x1d8] sm:$0xff] %v1358_v17  ;;  %v1379_v39 = vadd.f32 %v1959_v38, %v1378_v29  ;;  %v1406_v45 = vmul.f32 %v1963_v42, %v3595_v31  ;;  %v1402_v47 = vor.u32 1.1754944e-38, %v1401_v25  ;;  %vm1397_vm10 = vmor %vm1395_vm8, %vm1396_vm9  ;;  %vm1410_vm11 = vweird.f32 %v3595_v31 }
 0x12b   : > { %v1368_v33 = vsel %vm1367_vm3, %v1957_v11, %v1364_v27  ;;  %v1392_v35 = vsub.f32 1.0, %v1391_v28  ;;  %vm1411_vm12 = vweird.f32 %v1963_v42  ;;  %v1414_v49 = vand.u32 2147483647, %v3595_v31 }
 0x12c   : > { %v1373_v41 = vsel %vm1370_vm5, %v1372_v16, %v1368_v33  ;;  %v1383_v53 = vsel %vm3626_vm6, %v1959_v38, %v1379_v39  ;;  %v1407_v48 = vsub.f32 1.0, %v1406_v45  ;;  %vm1400_vm13 = vcmp.eq.f32.partialorder %v1399_v44, 8.507059e+37  ;;  %vm1412_vm15 = vmor %vm1410_vm11, %vm1411_vm12 }
 0x12d   : > { %1480 = vst [vmem:[%s2291_s17 + $0x1e0] sm:$0xff] %v1373_v41  ;;  %v1388_v43 = vsel %vm1385_vm7, %v1387_v32, %v1383_v53  ;;  %v1393_v37 = vmul.f32 %v1961_v15, %v1392_v35  ;;  %v1417_v52 = vor.u32 1.1754944e-38, %v1416_v40  ;;  %vm1415_vm14 = vcmp.eq.f32.partialorder %v1414_v49, 8.507059e+37 }
 0x12e   : > { %1481 = vst [vmem:[%s2291_s17 + $0x1e8] sm:$0xff] %v1388_v43  ;;  %v1408_v51 = vmul.f32 %v1963_v42, %v1407_v48 }
 0x12f   : > { %v1394_v50 = vadd.f32 %v1961_v15, %v1393_v37 }
 0x130   : > { %v1409_v57 = vadd.f32 %v1963_v42, %v1408_v51 }
 0x131   : > { %v1398_v55 = vsel %vm1397_vm10, %v1961_v15, %v1394_v50 }
 0x132   : > { %v1403_v56 = vsel %vm1400_vm13, %v1402_v47, %v1398_v55  ;;  %v1413_v59 = vsel %vm1412_vm15, %v1963_v42, %v1409_v57 }
 0x133   : > { %1482 = vst [vmem:[%s2291_s17 + $0x1f0] sm:$0xff] %v1403_v56  ;;  %v1418_v46 = vsel %vm1415_vm14, %v1417_v52, %v1413_v59 }
 0x134   : > { %1483 = vst [vmem:[%s2291_s17 + $0x1f8] sm:$0xff] %v1418_v46 }
 0x135   : > { %2021 = shalt.err (!%p2018_p4)
}
 0x136   : > { %s2064_s16 = smov 512   ;;  %s2065_s20 = smov 32  }
 0x137   : > { %1660 = dma.vmem_to_hbm [thread:$0]  (%p2126_p11), %s1499_s28, 8192, %s1501_s29, %s1485_s30, %s2064_s16, %s2064_s16, %s2065_s20  }
 0x138 PF: > { %s1515_s21 = sand.u32 1, %s2048_s6   ;;  %p3914_p7 = scmp.ge.s32.totalorder %s2060_s9, 2 }
 0x139   : > { %s1516_s22 = scalar_lea.sflag [#allocation4], %s1515_s21 }
 0x13a   : > { %p1667_p5 = pnand %p3914_p7, %p2130_p12 }
 0x13c   : > { %p1668_p8 = pneg %p1667_p5 }
 0x13e   : > { %2043 = dma.done.wait (%p1668_p8), %s1516_s22, 8192  }
 0x13f   : > { %2045 = vsyncadd (%p1668_p8), %s1516_s22, 4294959104  ;;  %p14_p10 = scmp.ge.s32.totalorder %s2101_s12, 4   ;;  %s3915_s6 = smov %s2052_s7 }
 0x140   : > { %s3916_s7 = smov %s2056_s8  ;;  %s3917_s8 = smov %s2113_s15 }
 0x141   : > { %s3918_s9 = smov %s2101_s12  ;;  %16 = sbr.rel (!%p14_p10) target bundleno = 5 (0x5), region = 69 }
 0x146   :  { %1522 = vsyncpa [#allocation3], 1 }
 0x147   :  { %1524 = vsyncpa [#allocation3 + $0x1], 1 }
 0x148   :  { %1525 = vsyncpa [#allocation4], 1 }
 0x149   :  { %1527 = vsyncpa [#allocation4 + $0x1], 1 }

</bundles_post_ra>
